<compile_context>
chip_gen: v6e
topology: v6e:2x2x1
jax: 0.10.0
libtpu: 0.0.40
codegen_flags: <defaults>
</compile_context>

<pallas_src>
import jax
import jax.numpy as jnp
from jax.experimental import pallas as pl
from jax.experimental.pallas import tpu as pltpu

_F32 = jnp.float32
_BF16 = jnp.bfloat16


# ----------------------------------------------------------------------------
# Pallas kernels
# ----------------------------------------------------------------------------
def _layer1_jump_kernel(a_ref, x16_ref, x_ref, win_ref, wout_ref, wloop_ref,
                        b_ref, res_ref, emb1_ref, emb1b16_ref, jump_ref,
                        acc_ref):
    """Layer-1 residual MGCN conv + (pre-scaled) jump aggregation.

    Grid = (row tiles, K tiles).  a_ref holds rows [a_in | a_out | a_jump*w]
    for this node-row tile restricted to the current K-slice of source nodes;
    the aggregation for all three adjacencies is ONE stacked MXU pass,
    accumulated over K into acc_ref.  Projection / residual / activation run
    once, at the last K step.
    """
    k = pl.program_id(1)

    @pl.when(k == 0)
    def _():
        acc_ref[...] = jnp.zeros_like(acc_ref)

    # (3*tm, tk) bf16 @ (tk, Dp) bf16 -> f32 accumulate.
    acc_ref[...] += jnp.dot(a_ref[...], x16_ref[...],
                            preferred_element_type=_F32)

    @pl.when(k == pl.num_programs(1) - 1)
    def _():
        tm = emb1_ref.shape[0]
        agg_in = acc_ref[0 * tm:1 * tm, :]
        agg_out = acc_ref[1 * tm:2 * tm, :]
        jump_raw = acc_ref[2 * tm:3 * tm, :]
        x_tile = x_ref[...]                                   # f32 row tile
        # Projection with pre-scaled (W/3) weights, kept in f32 (small matmuls,
        # keeps the ODE derivative tighter than an all-bf16 path).
        h = (jnp.dot(agg_in, win_ref[...], preferred_element_type=_F32)
             + jnp.dot(agg_out, wout_ref[...], preferred_element_type=_F32)
             + jnp.dot(x_tile, wloop_ref[...], preferred_element_type=_F32)
             + b_ref[...])
        emb1 = x_tile + res_ref[0, 0] * jnp.tanh(h)           # drop_l1: eval id
        emb1_ref[...] = emb1
        emb1b16_ref[...] = emb1.astype(_BF16)  # bf16 copy -> layer-2 MXU RHS
        jump_ref[...] = jump_raw               # jump_weight folded into a_jump


def _layer2_out_kernel(a_ref, x16_ref, x_ref, win_ref, wout_ref, wloop_ref,
                       b_ref, jump_ref, res_ref, dchange_ref, acc_ref):
    """Layer-2 residual MGCN conv + jump add, accumulated over the K axis."""
    k = pl.program_id(1)

    @pl.when(k == 0)
    def _():
        acc_ref[...] = jnp.zeros_like(acc_ref)

    acc_ref[...] += jnp.dot(a_ref[...], x16_ref[...],
                            preferred_element_type=_F32)

    @pl.when(k == pl.num_programs(1) - 1)
    def _():
        tm = dchange_ref.shape[0]
        agg_in = acc_ref[0 * tm:1 * tm, :]
        agg_out = acc_ref[1 * tm:2 * tm, :]
        x_tile = x_ref[...]
        h = (jnp.dot(agg_in, win_ref[...], preferred_element_type=_F32)
             + jnp.dot(agg_out, wout_ref[...], preferred_element_type=_F32)
             + jnp.dot(x_tile, wloop_ref[...], preferred_element_type=_F32)
             + b_ref[...])
        emb2 = x_tile + res_ref[0, 0] * jnp.tanh(h)           # drop_l2: eval id
        dchange_ref[...] = emb2 + jump_ref[...]               # drop_l2: eval id


# ----------------------------------------------------------------------------
# Constant precomputation (once, outside the hot ODE loop)
# ----------------------------------------------------------------------------
def build_graph_tensors(edge_index, edge_type, num_e, num_rel):
    src, dst = edge_index[0], edge_index[1]
    ones = jnp.ones(src.shape, _F32)

    a_in = jnp.zeros((num_e, num_e), _F32).at[dst, src].add(ones)
    c_in = jnp.zeros((num_e, 2 * num_rel), _F32).at[dst, edge_type].add(ones)
    deg_in = jnp.maximum(a_in.sum(axis=1, keepdims=True), 1.0)
    a_in, c_in = a_in / deg_in, c_in / deg_in

    a_out = jnp.zeros((num_e, num_e), _F32).at[src, dst].add(ones)
    c_out = jnp.zeros((num_e, 2 * num_rel), _F32).at[src, edge_type + num_rel].add(ones)
    deg_out = jnp.maximum(a_out.sum(axis=1, keepdims=True), 1.0)
    a_out, c_out = a_out / deg_out, c_out / deg_out
    return a_in, a_out, c_in, c_out


def build_jump_adj(edge_id_jump, edge_w_jump, num_e):
    src, dst = edge_id_jump[0], edge_id_jump[1]
    return jnp.zeros((num_e, num_e), _F32).at[dst, src].add(edge_w_jump)


def init_conv_params(key, in_dim, out_dim, num_rel):
    ks = jax.random.split(key, 5)
    s = 0.1
    return dict(
        rel=s * jax.random.normal(ks[0], (2 * num_rel, in_dim), _F32),
        r_loop=s * jax.random.normal(ks[1], (1, in_dim), _F32),
        w_in=s * jax.random.normal(ks[2], (in_dim, out_dim), _F32),
        w_out=s * jax.random.normal(ks[3], (in_dim, out_dim), _F32),
        w_loop=s * jax.random.normal(ks[4], (in_dim, out_dim), _F32),
        b=jnp.zeros((1, out_dim), _F32),
    )


def _round_up(x, m):
    return ((x + m - 1) // m) * m


def _pick_tile(n, pref):
    for c in (pref, 512, 256, 128):
        if 0 < c <= n and n % c == 0:
            return c
    return 128


def _pad2(m, rows, cols):
    return jnp.zeros((rows, cols), _F32).at[:m.shape[0], :m.shape[1]].set(m)


def _fold_layer(p, graph, num_e, n_pad, d_pad):
    """Fold one MGCNConvLayer into ((W_in, W_out, W_loop)/3 f32, B f32) with
    the 1/3 averaging and all state-independent (c_in/c_out/rel/r_loop/bias)
    terms baked into B."""
    _, _, c_in, c_out = graph
    w_in, w_out, w_loop = p["w_in"], p["w_out"], p["w_loop"]
    third = 1.0 / 3.0
    ws = (_pad2(w_in * third, d_pad, d_pad),
          _pad2(w_out * third, d_pad, d_pad),
          _pad2(w_loop * third, d_pad, d_pad))
    const = (c_in @ (p["rel"] @ w_in) + c_out @ (p["rel"] @ w_out)
             + jnp.broadcast_to(p["r_loop"] @ w_loop, (num_e, w_loop.shape[1])))
    b_full = p["b"] - const * third                           # (num_e, d_out)
    return ws, _pad2(b_full, n_pad, d_pad)


def _tile_stack(mats, tm):
    """Row-interleave (N,N) matrices so each TM-row tile of the result holds
    [m0 | m1 | ...] rows for the same node-row range (one contiguous block)."""
    k = len(mats)
    n = mats[0].shape[0]
    s = jnp.stack(mats, axis=0)                               # (k, N, N)
    s = s.reshape(k, n // tm, tm, n).transpose(1, 0, 2, 3)
    return s.reshape(k * n, n)


def precompute_mgcn_constants(edge_index, edge_type, edge_id_jump, edge_w_jump,
                              num_e, num_rel, p1, p2, res, jump_weight,
                              emb_out_dim, d_pad=128, tm=None, tk=None):
    graph = build_graph_tensors(edge_index, edge_type, num_e, num_rel)
    a_in, a_out, _, _ = graph
    # Fold jump_weight into the jump adjacency (saves a per-step VPU multiply
    # and an SMEM read in kernel 1).
    a_jump = jump_weight * build_jump_adj(edge_id_jump, edge_w_jump, num_e)

    # Always tile: pad N to a multiple of 128 (no gridless fallback).
    n_pad = _round_up(num_e, 128)
    tm = _pick_tile(n_pad, 256 if tm is None else tm)   # bigger rows on v5e/v6e
    tk = _pick_tile(n_pad, 512 if tk is None else tk)   # K-tiling keeps VMEM N-independent

    a_in_p = _pad2(a_in, n_pad, n_pad)
    a_out_p = _pad2(a_out, n_pad, n_pad)
    a_jump_p = _pad2(a_jump, n_pad, n_pad)

    (win1, wout1, wloop1), b1 = _fold_layer(p1, graph, num_e, n_pad, d_pad)
    (win2, wout2, wloop2), b2 = _fold_layer(p2, graph, num_e, n_pad, d_pad)

    # VMEM budget from the actual double-buffered block sizes + scratch,
    # clamped so it stays under v7x's 64 MiB while generous on v5e/v6e.
    blk = (2 * (3 * tm * tk * 2 + tk * d_pad * 2 + 4 * tm * d_pad * 4
                + 3 * d_pad * d_pad * 4 + tm * d_pad * 2)
           + 3 * tm * d_pad * 4)
    vmem_limit = int(min(max(4 * blk, 32 * 1024 * 1024), 48 * 1024 * 1024))

    return dict(
        a_stack1=_tile_stack([a_in_p, a_out_p, a_jump_p], tm).astype(_BF16),
        a_stack2=_tile_stack([a_in_p, a_out_p], tm).astype(_BF16),
        win1=win1, wout1=wout1, wloop1=wloop1, b1=b1,
        win2=win2, wout2=wout2, wloop2=wloop2, b2=b2,
        scal=jnp.array([[res]], _F32),
        tm=tm, tk=tk, d_pad=d_pad, n_pad=n_pad, num_e=num_e,
        emb_out_dim=emb_out_dim, vmem_limit_bytes=vmem_limit,
    )


# ----------------------------------------------------------------------------
# forward(t, state) -> (change, dchange)   [state is kept padded by the caller]
# ----------------------------------------------------------------------------
def mgcn_layer_wrapper_forward(t, state, consts):
    del t                                   # unused, as in the PyTorch module
    emb_p, change = state                   # emb_p: (n_pad, d_pad) f32
    n, dp = consts["n_pad"], consts["d_pad"]
    tm, tk = consts["tm"], consts["tk"]
    grid = (n // tm, n // tk)

    emb16 = emb_p.astype(_BF16)             # ONE hoisted cast per forward call

    cp = pltpu.CompilerParams(
        dimension_semantics=("parallel", "arbitrary"),
        vmem_limit_bytes=consts["vmem_limit_bytes"])

    row_f32 = pl.BlockSpec((tm, dp), lambda i, k: (i, 0))
    row_bf16 = pl.BlockSpec((tm, dp), lambda i, k: (i, 0))
    kslice_bf16 = pl.BlockSpec((tk, dp), lambda i, k: (k, 0))
    w_spec = pl.BlockSpec((dp, dp), lambda i, k: (0, 0))
    smem = pl.BlockSpec(memory_space=pltpu.MemorySpace.SMEM)

    # --- call 1: layer 1 (residual) + pre-scaled jump aggregation -----------
    emb1_p, emb1_16, jump_p = pl.pallas_call(
        _layer1_jump_kernel,
        grid=grid,
        in_specs=[
            pl.BlockSpec((3 * tm, tk), lambda i, k: (i, k)),  # [a_in|a_out|a_jump*w]
            kslice_bf16,                                      # emb bf16 (MXU RHS)
            row_f32,                                          # emb f32 (residual/loop)
            w_spec, w_spec, w_spec,                           # W_in/3, W_out/3, W_loop/3
            row_f32,                                          # folded bias B1
            smem,                                             # res
        ],
        out_specs=[row_f32, row_bf16, row_f32],
        out_shape=(jax.ShapeDtypeStruct((n, dp), _F32),
                   jax.ShapeDtypeStruct((n, dp), _BF16),
                   jax.ShapeDtypeStruct((n, dp), _F32)),
        scratch_shapes=[pltpu.VMEM((3 * tm, dp), _F32)],
        compiler_params=cp,
    )(consts["a_stack1"], emb16, emb_p,
      consts["win1"], consts["wout1"], consts["wloop1"], consts["b1"],
      consts["scal"])

    # --- call 2: layer 2 (residual) + jump add -------------------------------
    dchange_p = pl.pallas_call(
        _layer2_out_kernel,
        grid=grid,
        in_specs=[
            pl.BlockSpec((2 * tm, tk), lambda i, k: (i, k)),  # [a_in|a_out]
            kslice_bf16,                                      # emb1 bf16 (from call 1)
            row_f32,                                          # emb1 f32
            w_spec, w_spec, w_spec,                           # W_in/3, W_out/3, W_loop/3
            row_f32,                                          # B2
            row_f32,                                          # jump
            smem,                                             # res
        ],
        out_specs=row_f32,
        out_shape=jax.ShapeDtypeStruct((n, dp), _F32),
        scratch_shapes=[pltpu.VMEM((2 * tm, dp), _F32)],
        compiler_params=cp,
    )(consts["a_stack2"], emb1_16, emb1_p,
      consts["win2"], consts["wout2"], consts["wloop2"], consts["b2"],
      jump_p, consts["scal"])

    return (change, dchange_p)              # dchange stays padded for the solver


# ----------------------------------------------------------------------------
# Pure-JAX f32 reference (unfused, unpadded)
# ----------------------------------------------------------------------------
def _ref_conv(x, graph, p):
    a_in, a_out, c_in, c_out = graph
    agg_in = a_in @ x - c_in @ p["rel"]
    agg_out = a_out @ x - c_out @ p["rel"]
    loop = x - p["r_loop"]
    return jnp.tanh((agg_in @ p["w_in"] + agg_out @ p["w_out"]
                     + loop @ p["w_loop"]) / 3.0 + p["b"])


def _ref_forward(state, graph, p1, p2, a_jump, res, jump_weight):
    emb, change = state
    jump_emb = emb
    emb = emb + res * _ref_conv(emb, graph, p1)
    emb = emb + res * _ref_conv(emb, graph, p2)
    dchange = emb + jump_weight * (a_jump @ jump_emb)
    return (change, dchange)


# ----------------------------------------------------------------------------
if __name__ == "__main__":
    num_e, num_rel = 256, 4
    init_dim = hid_dim = emb_dim = 32         # p.initsize = p.hidsize = p.embsize
    n_edges, n_jump_edges = 1024, 256

    key = jax.random.PRNGKey(0)
    k = jax.random.split(key, 10)

    edge_index = jax.random.randint(k[0], (2, n_edges), 0, num_e, jnp.int32)
    edge_type = jax.random.randint(k[1], (n_edges,), 0, num_rel, jnp.int32)
    edge_id_jump = jax.random.randint(k[2], (2, n_jump_edges), 0, num_e, jnp.int32)
    edge_w_jump = jax.random.uniform(k[3], (n_jump_edges,), jnp.float32)

    emb = 0.1 * jax.random.normal(k[4], (num_e, init_dim), jnp.float32)
    change = 0.1 * jax.random.normal(k[5], (num_e, emb_dim), jnp.float32)

    p1 = init_conv_params(k[6], init_dim, hid_dim, num_rel)    # conv1
    p2 = init_conv_params(k[7], hid_dim, emb_dim, num_rel)     # conv2 (core_layer==2)

    res_param = 0.1            # torch.FloatTensor([0.1])
    jump_weight = 0.5

    # tm=tk=128 at this toy size so the (parallel, reduction) grid is (2, 2);
    # at realistic N the defaults (tm=256, tk=512) kick in.
    consts = precompute_mgcn_constants(
        edge_index, edge_type, edge_id_jump, edge_w_jump, num_e, num_rel,
        p1, p2, res_param, jump_weight, emb_out_dim=emb_dim, tm=128, tk=128)

    # ODE-state padding done ONCE outside the hot callee (the solver would
    # integrate the padded state and slice once after integration).
    emb_p = jnp.zeros((consts["n_pad"], consts["d_pad"]), _F32)
    emb_p = emb_p.at[:num_e, :init_dim].set(emb)

    change_out, dchange_p = mgcn_layer_wrapper_forward(0.0, (emb_p, change), consts)
    jax.block_until_ready(dchange_p)
    dchange = dchange_p[:num_e, :emb_dim]

    graph = build_graph_tensors(edge_index, edge_type, num_e, num_rel)
    a_jump = build_jump_adj(edge_id_jump, edge_w_jump, num_e)
    ref_change, ref_dchange = _ref_forward(
        (emb, change), graph, p1, p2, a_jump, res_param, jump_weight)

    assert jnp.allclose(change_out, ref_change)
    max_err = float(jnp.max(jnp.abs(dchange - ref_dchange)))
    # bf16 adjacency/activation MXU operands with f32 accumulation and f32
    # projections -> looser tolerance than pure f32.
    assert max_err < 1e-2, max_err
    print("KERNEL_OK")
</pallas_src>

<mosaic_0001>
module attributes {stable_mosaic.version = 11 : i64} {
  func.func @_layer1_jump_kernel(%arg0: i32, %arg1: i32, %arg2: memref<384x128xbf16, #tpu.memory_space<vmem>>, %arg3: memref<128x128xbf16, #tpu.memory_space<vmem>>, %arg4: memref<128x128xf32, #tpu.memory_space<vmem>>, %arg5: memref<128x128xf32, #tpu.memory_space<vmem>>, %arg6: memref<128x128xf32, #tpu.memory_space<vmem>>, %arg7: memref<128x128xf32, #tpu.memory_space<vmem>>, %arg8: memref<128x128xf32, #tpu.memory_space<vmem>>, %arg9: memref<1x1xf32, #tpu.memory_space<smem>>, %arg10: memref<128x128xf32, #tpu.memory_space<vmem>>, %arg11: memref<128x128xbf16, #tpu.memory_space<vmem>>, %arg12: memref<128x128xf32, #tpu.memory_space<vmem>>, %arg13: memref<384x128xf32, #tpu.memory_space<vmem>>) attributes {dimension_semantics = [#tpu.dimension_semantics<parallel>, #tpu.dimension_semantics<arbitrary>], iteration_bounds = array<i64: 2, 2>, scalar_prefetch = 0 : i64, scratch_operands = 1 : i64, tpu.core_type = #tpu.core_type<tc>, window_params = [{transform_indices = @transform_0, window_bounds = array<i64: 384, 128>}, {transform_indices = @transform_1, window_bounds = array<i64: 128, 128>}, {transform_indices = @transform_2, window_bounds = array<i64: 128, 128>}, {pipeline_mode = #tpu.pipeline_mode<synchronous>, transform_indices = @transform_3, window_bounds = array<i64: 128, 128>}, {pipeline_mode = #tpu.pipeline_mode<synchronous>, transform_indices = @transform_4, window_bounds = array<i64: 128, 128>}, {pipeline_mode = #tpu.pipeline_mode<synchronous>, transform_indices = @transform_5, window_bounds = array<i64: 128, 128>}, {transform_indices = @transform_6, window_bounds = array<i64: 128, 128>}, {transform_indices = @transform_7, window_bounds = array<i64: 1, 1>}, {transform_indices = @transform_8, window_bounds = array<i64: 128, 128>}, {transform_indices = @transform_9, window_bounds = array<i64: 128, 128>}, {transform_indices = @transform_10, window_bounds = array<i64: 128, 128>}]} {
    %c0_i32 = arith.constant 0 : i32
    %0 = arith.cmpi eq, %arg1, %c0_i32 : i32
    %1 = arith.extui %0 : i1 to i32
    %c0_i32_0 = arith.constant 0 : i32
    %2 = arith.cmpi ne, %1, %c0_i32_0 : i32
    scf.if %2 {
      %cst_9 = arith.constant 0.000000e+00 : f32
      %12 = vector.broadcast %cst_9 : f32 to vector<384x128xf32>
      %c0_10 = arith.constant 0 : index
      %c0_11 = arith.constant 0 : index
      %13 = vector.load %arg13[%c0_10, %c0_11] : memref<384x128xf32, #tpu.memory_space<vmem>>, vector<384x128xf32>
      tpu.vector_store %arg13[%c0_10, %c0_11], %12 {strides = array<i32>} : memref<384x128xf32, #tpu.memory_space<vmem>>, vector<384x128xf32>,
    } else {
    }
    %c0 = arith.constant 0 : index
    %c0_1 = arith.constant 0 : index
    %3 = vector.load %arg13[%c0, %c0_1] : memref<384x128xf32, #tpu.memory_space<vmem>>, vector<384x128xf32>
    %c0_2 = arith.constant 0 : index
    %c0_3 = arith.constant 0 : index
    %4 = vector.load %arg2[%c0_2, %c0_3] : memref<384x128xbf16, #tpu.memory_space<vmem>>, vector<384x128xbf16>
    %c0_4 = arith.constant 0 : index
    %c0_5 = arith.constant 0 : index
    %5 = vector.load %arg3[%c0_4, %c0_5] : memref<128x128xbf16, #tpu.memory_space<vmem>>, vector<128x128xbf16>
    %cst = arith.constant dense<0.000000e+00> : vector<384x128xf32>
    %6 = tpu.matmul %4, %5, %cst {dimension_numbers = #tpu.dot_dimension_numbers<[1], [0], [0], [1], [0, 0, 1, 1], [], []>} : vector<384x128xbf16>, vector<128x128xbf16>, vector<384x128xf32> -> vector<384x128xf32>
    %7 = arith.addf %3, %6 : vector<384x128xf32>
    %c0_6 = arith.constant 0 : index
    %c0_7 = arith.constant 0 : index
    %8 = vector.load %arg13[%c0_6, %c0_7] : memref<384x128xf32, #tpu.memory_space<vmem>>, vector<384x128xf32>
    tpu.vector_store %arg13[%c0_6, %c0_7], %7 {strides = array<i32>} : memref<384x128xf32, #tpu.memory_space<vmem>>, vector<384x128xf32>,
    %c1_i32 = arith.constant 1 : i32
    %9 = arith.cmpi eq, %arg1, %c1_i32 : i32
    %10 = arith.extui %9 : i1 to i32
    %c0_i32_8 = arith.constant 0 : i32
    %11 = arith.cmpi ne, %10, %c0_i32_8 : i32
    scf.if %11 {
      %c0_9 = arith.constant 0 : index
      %c0_10 = arith.constant 0 : index
      %12 = vector.load %arg13[%c0_9, %c0_10] : memref<384x128xf32, #tpu.memory_space<vmem>>, vector<128x128xf32>
      %c128 = arith.constant 128 : index
      %c0_11 = arith.constant 0 : index
      %13 = vector.load %arg13[%c128, %c0_11] : memref<384x128xf32, #tpu.memory_space<vmem>>, vector<128x128xf32>
      %c256 = arith.constant 256 : index
      %c0_12 = arith.constant 0 : index
      %14 = vector.load %arg13[%c256, %c0_12] : memref<384x128xf32, #tpu.memory_space<vmem>>, vector<128x128xf32>
      %c0_13 = arith.constant 0 : index
      %c0_14 = arith.constant 0 : index
      %15 = vector.load %arg4[%c0_13, %c0_14] : memref<128x128xf32, #tpu.memory_space<vmem>>, vector<128x128xf32>
      %c0_15 = arith.constant 0 : index
      %c0_16 = arith.constant 0 : index
      %16 = vector.load %arg5[%c0_15, %c0_16] : memref<128x128xf32, #tpu.memory_space<vmem>>, vector<128x128xf32>
      %cst_17 = arith.constant dense<0.000000e+00> : vector<128x128xf32>
      %17 = tpu.matmul %12, %16, %cst_17 {dimension_numbers = #tpu.dot_dimension_numbers<[1], [0], [0], [1], [0, 0, 1, 1], [], []>} : vector<128x128xf32>, vector<128x128xf32>, vector<128x128xf32> -> vector<128x128xf32>
      %c0_18 = arith.constant 0 : index
      %c0_19 = arith.constant 0 : index
      %18 = vector.load %arg6[%c0_18, %c0_19] : memref<128x128xf32, #tpu.memory_space<vmem>>, vector<128x128xf32>
      %cst_20 = arith.constant dense<0.000000e+00> : vector<128x128xf32>
      %19 = tpu.matmul %13, %18, %cst_20 {dimension_numbers = #tpu.dot_dimension_numbers<[1], [0], [0], [1], [0, 0, 1, 1], [], []>} : vector<128x128xf32>, vector<128x128xf32>, vector<128x128xf32> -> vector<128x128xf32>
      %20 = arith.addf %17, %19 : vector<128x128xf32>
      %c0_21 = arith.constant 0 : index
      %c0_22 = arith.constant 0 : index
      %21 = vector.load %arg7[%c0_21, %c0_22] : memref<128x128xf32, #tpu.memory_space<vmem>>, vector<128x128xf32>
      %cst_23 = arith.constant dense<0.000000e+00> : vector<128x128xf32>
      %22 = tpu.matmul %15, %21, %cst_23 {dimension_numbers = #tpu.dot_dimension_numbers<[1], [0], [0], [1], [0, 0, 1, 1], [], []>} : vector<128x128xf32>, vector<128x128xf32>, vector<128x128xf32> -> vector<128x128xf32>
      %23 = arith.addf %20, %22 : vector<128x128xf32>
      %c0_24 = arith.constant 0 : index
      %c0_25 = arith.constant 0 : index
      %24 = vector.load %arg8[%c0_24, %c0_25] : memref<128x128xf32, #tpu.memory_space<vmem>>, vector<128x128xf32>
      %25 = arith.addf %23, %24 : vector<128x128xf32>
      %c0_26 = arith.constant 0 : index
      %c0_27 = arith.constant 0 : index
      %26 = memref.load %arg9[%c0_26, %c0_27] : memref<1x1xf32, #tpu.memory_space<smem>>
      %27 = math.tanh %25 : vector<128x128xf32>
      %28 = vector.broadcast %26 : f32 to vector<128x128xf32>
      %29 = arith.mulf %28, %27 : vector<128x128xf32>
      %30 = arith.addf %15, %29 : vector<128x128xf32>
      %c0_28 = arith.constant 0 : index
      %c0_29 = arith.constant 0 : index
      %31 = vector.load %arg10[%c0_28, %c0_29] : memref<128x128xf32, #tpu.memory_space<vmem>>, vector<128x128xf32>
      tpu.vector_store %arg10[%c0_28, %c0_29], %30 {strides = array<i32>} : memref<128x128xf32, #tpu.memory_space<vmem>>, vector<128x128xf32>,
      %32 = arith.truncf %30 : vector<128x128xf32> to vector<128x128xbf16>
      %c0_30 = arith.constant 0 : index
      %c0_31 = arith.constant 0 : index
      %33 = vector.load %arg11[%c0_30, %c0_31] : memref<128x128xbf16, #tpu.memory_space<vmem>>, vector<128x128xbf16>
      tpu.vector_store %arg11[%c0_30, %c0_31], %32 {strides = array<i32>} : memref<128x128xbf16, #tpu.memory_space<vmem>>, vector<128x128xbf16>,
      %c0_32 = arith.constant 0 : index
      %c0_33 = arith.constant 0 : index
      %34 = vector.load %arg12[%c0_32, %c0_33] : memref<128x128xf32, #tpu.memory_space<vmem>>, vector<128x128xf32>
      tpu.vector_store %arg12[%c0_32, %c0_33], %14 {strides = array<i32>} : memref<128x128xf32, #tpu.memory_space<vmem>>, vector<128x128xf32>,
    } else {
    }
    return
  }
  func.func @transform_0(%arg0: i32, %arg1: i32) -> (i32, i32) {
    %c0_i32 = arith.constant 0 : i32
    return %arg0, %arg1 : i32, i32
  }
  func.func @transform_1(%arg0: i32, %arg1: i32) -> (i32, i32) {
    %c0_i32 = arith.constant 0 : i32
    %c0_i32_0 = arith.constant 0 : i32
    return %arg1, %c0_i32 : i32, i32
  }
  func.func @transform_2(%arg0: i32, %arg1: i32) -> (i32, i32) {
    %c0_i32 = arith.constant 0 : i32
    %c0_i32_0 = arith.constant 0 : i32
    return %arg0, %c0_i32 : i32, i32
  }
  func.func @transform_3(%arg0: i32, %arg1: i32) -> (i32, i32) {
    %c0_i32 = arith.constant 0 : i32
    %c0_i32_0 = arith.constant 0 : i32
    %c0_i32_1 = arith.constant 0 : i32
    return %c0_i32, %c0_i32_0 : i32, i32
  }
  func.func @transform_4(%arg0: i32, %arg1: i32) -> (i32, i32) {
    %c0_i32 = arith.constant 0 : i32
    %c0_i32_0 = arith.constant 0 : i32
    %c0_i32_1 = arith.constant 0 : i32
    return %c0_i32, %c0_i32_0 : i32, i32
  }
  func.func @transform_5(%arg0: i32, %arg1: i32) -> (i32, i32) {
    %c0_i32 = arith.constant 0 : i32
    %c0_i32_0 = arith.constant 0 : i32
    %c0_i32_1 = arith.constant 0 : i32
    return %c0_i32, %c0_i32_0 : i32, i32
  }
  func.func @transform_6(%arg0: i32, %arg1: i32) -> (i32, i32) {
    %c0_i32 = arith.constant 0 : i32
    %c0_i32_0 = arith.constant 0 : i32
    return %arg0, %c0_i32 : i32, i32
  }
  func.func @transform_7(%arg0: i32, %arg1: i32) -> (i32, i32) {
    %c0_i32 = arith.constant 0 : i32
    %c0_i32_0 = arith.constant 0 : i32
    %c0_i32_1 = arith.constant 0 : i32
    return %c0_i32, %c0_i32_0 : i32, i32
  }
  func.func @transform_8(%arg0: i32, %arg1: i32) -> (i32, i32) {
    %c0_i32 = arith.constant 0 : i32
    %c0_i32_0 = arith.constant 0 : i32
    return %arg0, %c0_i32 : i32, i32
  }
  func.func @transform_9(%arg0: i32, %arg1: i32) -> (i32, i32) {
    %c0_i32 = arith.constant 0 : i32
    %c0_i32_0 = arith.constant 0 : i32
    return %arg0, %c0_i32 : i32, i32
  }
  func.func @transform_10(%arg0: i32, %arg1: i32) -> (i32, i32) {
    %c0_i32 = arith.constant 0 : i32
    %c0_i32_0 = arith.constant 0 : i32
    return %arg0, %c0_i32 : i32, i32
  }
}

</mosaic_0001>

<bundles_post_ra>
// kernel: tpu_custom_call.1
= control target key start
LH: loop header
LB: loop body
LE: loop exit
PB: predicated region body
PF: predicated region fallthrough
CT: control target
= control target key end

     0   :  { %s4351_s0 = inlined_call_operand.hbm [shape: bf16[768,256], index: 0, kind: input, shape index: {}]   ;;  %s4352_s1 = inlined_call_operand.hbm [shape: bf16[256,128], index: 1, kind: input, shape index: {}]   ;;  %s4353_s2 = inlined_call_operand.hbm [shape: f32[256,128], index: 2, kind: input, shape index: {}]   ;;  %s4354_s3 = inlined_call_operand.hbm [shape: f32[128,128], index: 3, kind: input, shape index: {}]   ;;  %s4355_s4 = inlined_call_operand.hbm [shape: f32[128,128], index: 4, kind: input, shape index: {}]   ;;  %s4356_s5 = inlined_call_operand.hbm [shape: f32[128,128], index: 5, kind: input, shape index: {}]   ;;  %s4357_s6 = inlined_call_operand.hbm [shape: f32[256,128], index: 6, kind: input, shape index: {}]   ;;  %s4358_s7 = inlined_call_operand.<no memory space> [shape: f32[1,1], index: 7, kind: input, shape index: {}]   ;;  %s4359_s8 = inlined_call_operand.hbm [shape: f32[256,128], index: 8, kind: output, shape index: {0}]   ;;  %s4360_s9 = inlined_call_operand.hbm [shape: bf16[256,128], index: 9, kind: output, shape index: {1}]   ;;  %s4361_s10 = inlined_call_operand.hbm [shape: f32[256,128], index: 10, kind: output, shape index: {2}]  }
   0x1   :  { %4390 = sst [smem:[#allocation44_spill]] %s4351_s0 }
   0x2   :  { %4391 = sst [smem:[#allocation45_spill]] %s4352_s1 }
   0x3   :  { %4392 = sst [smem:[#allocation46_spill]] %s4353_s2 }
   0x4   :  { %4393 = sst [smem:[#allocation47_spill]] %s4354_s3 }
   0x5   :  { %4394 = sst [smem:[#allocation48_spill]] %s4355_s4 }
   0x6   :  { %4395 = sst [smem:[#allocation49_spill]] %s4356_s5 }
   0x7   :  { %4396 = sst [smem:[#allocation50_spill]] %s4357_s6 }
   0x8   :  { %4397 = sst [smem:[#allocation51_spill]] %s4359_s8 }
   0x9   :  { %4398 = sst [smem:[#allocation52_spill]] %s4360_s9 }
   0xa   :  { %4399 = sst [smem:[#allocation53_spill]] %s4361_s10 }
   0xb   :  { %16 = sst [smem:[#allocation3]] %s4358_s7 }
   0xc   :  { %17 = vsyncpa [#allocation5], 0 }
   0xd   :  { %19 = vsyncpa [#allocation5 + $0x1], 0 }
   0xe   :  { %20 = vsyncpa [#allocation8], 0 }
   0xf   :  { %22 = vsyncpa [#allocation8 + $0x1], 0 }
  0x10   :  { %23 = vsyncpa [#allocation11], 0 }
  0x11   :  { %24 = vsyncpa [#allocation14], 0 }
  0x12   :  { %25 = vsyncpa [#allocation6], 0 }
  0x13   :  { %27 = vsyncpa [#allocation6 + $0x1], 0 }
  0x14   :  { %28 = vsyncpa [#allocation18], 0 }
  0x15   :  { %30 = vsyncpa [#allocation18 + $0x1], 0  ;;  %s3625_s15 = smov 0   ;;  %s3627_s16 = smov 0  }
  0x16   :  { %s3629_s17 = smov 0   ;;  %s3631_s18 = smov 0  }
  0x17   :  { %s3633_s19 = smov 0   ;;  %s3635_s7 = smov 0  }
  0x18   :  { %s3637_s20 = smov 0   ;;  %s3639_s21 = smov 0  }
  0x19   :  { %s3641_s22 = smov 0   ;;  %s3643_s23 = smov 0  }
  0x1a   :  { %s3645_s24 = smov 0   ;;  %s3647_s25 = smov 0  }
  0x1b   :  { %s3649_s26 = smov 0   ;;  %s3651_s27 = smov 0  }
  0x1c LB: > { %4400 = sst [smem:[#allocation28_spill]] %s3494_s15  ;;  %s3696_s28 = sadd.s32 4294967295, %s3546_s27   ;;  %s3546_s27 = sphi %s3651_s27, %s36_s27   ;;  %s3542_s26 = sphi %s3649_s26, %s4480_s26   ;;  %s3538_s25 = sphi %s3647_s25, %s4479_s25   ;;  %s3534_s24 = sphi %s3645_s24, %s4487_s24   ;;  %s3530_s23 = sphi %s3643_s23, %s4477_s23   ;;  %s3526_s22 = sphi %s3641_s22, %s4476_s22   ;;  %s3522_s21 = sphi %s3639_s21, %s4475_s21   ;;  %s3518_s20 = sphi %s3637_s20, %s4474_s20   ;;  %s3514_s7 = sphi %s3635_s7, %s4486_s7   ;;  %s3510_s19 = sphi %s3633_s19, %s4485_s19   ;;  %s3506_s18 = sphi %s3631_s18, %s4484_s18   ;;  %s3502_s17 = sphi %s3629_s17, %s4483_s17   ;;  %s3498_s16 = sphi %s3627_s16, %s4482_s16   ;;  %s3494_s15 = sphi %s3625_s15, %s4481_s15  }
  0x1d   : > { %4401 = sst [smem:[#allocation29_spill]] %s3522_s21  ;;  %p2314_p0 = scmp.ge.s32.totalorder %s3546_s27, 1 }
  0x1e   : > { %4402 = sst [smem:[#allocation30_spill]] %s3526_s22  ;;  %p4379_p1 = scmp.eq.s32.totalorder %s3696_s28, 0 }
  0x1f   : > { %4403 = sst [smem:[#allocation31_spill]] %s3530_s23  ;;  %p321_p3 = scmp.lt.s32.totalorder %s3546_s27, 5 }
  0x20   : > { %4404 = sst [smem:[#allocation32_spill]] %s3534_s24  ;;  %s3548_s30 = smov [#allocation10]  }
  0x21   : > { %4405 = sst [smem:[#allocation33_spill]] %s3538_s25  ;;  %p3702_p4 = pnand %p2314_p0, %p321_p3 }
  0x22   : > { %4406 = sst [smem:[#allocation34_spill]] %s3542_s26  ;;  %s333_s11 = sshll.u32 %s3548_s30, 4  ;;  %s334_s11 = int_to_ptr.vmem [resolvable:$true] %s333_s11 }
  0x23   : > { %s4407_s29 = scalar_select %p3702_p4, 1, 0 }
  0x24   : > { %p2907_p5 = pneg %p3702_p4  ;;  %s3147_s13 = scalar_lea.vmem %s334_s11, 2048 }
  0x25   : > { %4408 = sst [smem:[#allocation35_spill]] %s4407_s29  ;;  %p3148_p8 = scmp.ne.s32.totalorder %s334_s11, %s3147_s13 }
  0x26   : > { %p3710_p6 = pnand %p2907_p5, %p4379_p1  ;;  %p3155_p11 = scmp.lt.s32.totalorder %s334_s11, %s334_s11 }
  0x27   : > { %p3156_p12 = scmp.lt.s32.totalorder %s3147_s13, %s3147_s13 }
  0x28   : > { %p4377_p7 = pneg %p3710_p6 }
  0x29   : > { %p3157_p13 = por %p3156_p12, %p3155_p11 }
  0x2a   : > { %p3150_p9 = pnand %p3148_p8, %p4377_p7 }
  0x2c   : > { %p3151_p10 = pneg %p3150_p9 }
  0x2e   : > { %p3158_p0 = pnand %p3157_p13, %p3151_p10 }
  0x30   : > { %3161 = shalt.err (!%p3158_p0)
}
  0x31   : > { %s4368_s14 = smov 128   ;;  %s4366_s30 = smov 8  }
  0x32   : > { %s4410_s3 = sld [smem:[#allocation47_spill]]  ;;  %s45_s8 = sadd.s32 1, %s3538_s25 }
  0x33   : > { %s48_s9 = sadd.s32 1, %s3542_s26  ;;  %p46_p3 = scmp.ge.s32.totalorder %s45_s8, 2 }
  0x34   : > { %s57_s24 = sadd.s32 1, %s3526_s22  ;;  %p64_p5 = scmp.ne.s32.totalorder %s3526_s22, %s3522_s21 }
  0x35   : > { %p4382_p8 = scmp.eq.s32.totalorder %s3546_s27, 0  ;;  %s4489_s8 = smov (%p46_p3, %s45_s8), 0 }
  0x36   : > { %4411 = sst [smem:[#allocation36_spill]] %s4489_s8  ;;  %s4491_s9 = smov (!%p46_p3, %s48_s9), %s3542_s26 }
  0x37   : > { %s3738_s23 = ssub.s32 %s3538_s25, %s4489_s8  ;;  %p3742_p9 = por %p4382_p8, %p64_p5 }
  0x38   : > { %2910 = dma.hbm_to_vmem [thread:$0]  (!%p3710_p6), %s4410_s3, 2048, %s334_s11, [#allocation11], %s4368_s14, %s4368_s14, %s4366_s30  }
  0x39   : > { %p50_p10 = scmp.ge.s32.totalorder %s4491_s9, 2  ;;  %p70_p11 = scmp.ne.s32.totalorder %s3522_s21, %s3518_s20 }
  0x3a   : > { %p81_p12 = scmp.eq.s32.totalorder %s3738_s23, 0  ;;  %p4378_p13 = scmp.lt.s32.totalorder %s3546_s27, 4 }
  0x3b   : > { %s4493_s9 = smov (%p50_p10, %s4491_s9), 0  ;;  %p3754_p0 = por %p4379_p1, %p70_p11 }
  0x3c   : > { %4413 = sst [smem:[#allocation37_spill]] %s4493_s9  ;;  %s3761_s30 = ssub.s32 %s3542_s26, %s4493_s9 }
  0x3d   : > { %s4414_s11 = scalar_select %p3754_p0, 1, 0 }
  0x3e   : > { %4416 = sst [smem:[#allocation39_spill]] %s3761_s30  ;;  %s54_s14 = sor.u32 %s3738_s23, %s3761_s30 }
  0x3f   : > { %4415 = sst [smem:[#allocation38_spill]] %s4414_s11  ;;  %p55_p5 = scmp.eq.s32.totalorder %s54_s14, 0 }
  0x40   : > { %s378_s20 = sand.u32 1, %s3526_s22   ;;  %p3771_p10 = pnand %p4378_p13, %p3742_p9 }
  0x41   : > { %s2879_s3 = smul.u32 192, %s378_s20  ;;  %s4419_s0 = sld [smem:[#allocation44_spill]] }
  0x42   : > { %s3776_s21 = scalar_select %p55_p5, %s3526_s22, %s57_s24  }
  0x43   : > { %s2401_s13 = smul.u32 96, %s3542_s26  ;;  %s380_s11 = scalar_lea.vmem [#allocation4], %s2879_s3 }
  0x44   : > { %4418 = sst [smem:[#allocation40_spill]] %s3776_s21  ;;  %s389_s9 = sshll.u32 %s380_s11, 4  ;;  %s390_s9 = int_to_ptr.vmem [resolvable:$true] %s389_s9 }
  0x45   : > { %s386_s29 = sadd.s32 %s3538_s25, %s2401_s13  ;;  %s4420_s20 = sand.u32 1, %s3546_s27  }
  0x46   : > { %s2320_s6 = sshll.u32 %s386_s29, 6  ;;  %s3785_s10 = scalar_lea.sflag [#allocation5], %s4420_s20 }
  0x47   : > { %s388_s14 = scalar_lea.hbm %s4419_s0, %s2320_s6  ;;  %p3164_p9 = pneg %p3771_p10 }
  0x48   : > { %s3175_s30 = scalar_lea.vmem %s390_s9, 3072  ;;  %s3551_s24 = smov [#allocation4]  }
  0x49   : > { %p3176_p11 = scmp.ne.s32.totalorder %s390_s9, %s3175_s30  ;;  %s3180_s21 = sshll.u32 %s3551_s24, 4  ;;  %s3181_s21 = int_to_ptr.vmem [resolvable:$false] %s3180_s21 }
  0x4a   : > { %s3182_s3 = scalar_lea.vmem %s3181_s21, 6144  ;;  %p3183_p3 = scmp.lt.s32.totalorder %s390_s9, %s3181_s21 }
  0x4b   : > { %p3178_p2 = pnand %p3176_p11, %p3164_p9  ;;  %p3184_p7 = scmp.lt.s32.totalorder %s3182_s3, %s3175_s30 }
  0x4d   : > { %p3179_p5 = pneg %p3178_p2  ;;  %p3185_p13 = por %p3184_p7, %p3183_p3 }
  0x4f   : > { %p3186_p1 = pnand %p3185_p13, %p3179_p5 }
  0x51   : > { %3189 = shalt.err (!%p3186_p1)
}
  0x52   : > { %s4380_s2 = smov 64   ;;  %s4381_s6 = smov 4  }
  0x53   : > { %s4421_s15 = smov 128   ;;  %s83_s21 = sadd.s32 1, %s3514_s7 }
  0x54   : > { %2920 = dma.hbm_to_vmem [thread:$0]  (!%p3771_p10), %s388_s14, 3072, %s390_s9, %s3785_s10, %s4421_s15, %s4380_s2, %s4381_s6  }
  0x55   : > { %p90_p1 = scmp.ne.s32.totalorder %s3514_s7, %s3510_s19  ;;  %p96_p7 = scmp.ne.s32.totalorder %s3510_s19, %s3506_s18 }
  0x56   : > { %s3801_s29 = scalar_select %p81_p12, %s3514_s7, %s83_s21  }
  0x57   : > { %p92_p2 = por %p90_p1, %p4382_p8  ;;  %s401_s30 = sand.u32 1, %s3514_s7  }
  0x58   : > { %4422 = sst [smem:[#allocation41_spill]] %s3801_s29  ;;  %p4423_p13 = scmp.eq.s32.totalorder %s3696_s28, 0 }
  0x59   : > { %s2321_s8 = sshll.u32 %s401_s30, 6  ;;  %s2402_s13 = sshll.u32 %s3538_s25, 10 }
  0x5a   : > { %p3810_p3 = por %p96_p7, %p4423_p13  ;;  %s4425_s1 = sld [smem:[#allocation45_spill]] }
  0x5b   : > { %s403_s14 = scalar_lea.vmem [#allocation7], %s2321_s8  ;;  %p4426_p12 = scmp.lt.s32.totalorder %s3546_s27, 4 }
  0x5c   : > { %s410_s3 = sshll.u32 %s403_s14, 4  ;;  %s3554_s18 = smov [#allocation12]   ;;  %s411_s3 = int_to_ptr.vmem [resolvable:$true] %s410_s3 }
  0x5d   : > { %p3820_p10 = pnand %p4426_p12, %p92_p2  ;;  %s346_s21 = sshll.u32 %s3554_s18, 4  ;;  %s347_s21 = int_to_ptr.vmem [resolvable:$true] %s346_s21 }
  0x5e   : > { %s4428_s2 = sand.u32 1, %s3546_s27   ;;  %s3203_s30 = scalar_lea.vmem %s411_s3, 1024 }
  0x5f   : > { %s3826_s6 = scalar_lea.sflag [#allocation8], %s4428_s2  ;;  %p3192_p9 = pneg %p3820_p10 }
  0x60   : > { %s409_s9 = scalar_lea.hbm %s4425_s1, %s2402_s13  ;;  %p3204_p11 = scmp.ne.s32.totalorder %s411_s3, %s3203_s30 }
  0x61   : > { %s3555_s8 = smov [#allocation7]  }
  0x62   : > { %p3206_p5 = pnand %p3204_p11, %p3192_p9  ;;  %s3208_s13 = sshll.u32 %s3555_s8, 4  ;;  %s3209_s13 = int_to_ptr.vmem [resolvable:$false] %s3208_s13 }
  0x63   : > { %s3210_s20 = scalar_lea.vmem %s3209_s13, 2048  ;;  %p3211_p2 = scmp.lt.s32.totalorder %s411_s3, %s3209_s13 }
  0x64   : > { %p3207_p1 = pneg %p3206_p5  ;;  %p3212_p7 = scmp.lt.s32.totalorder %s3210_s20, %s3203_s30 }
  0x66   : > { %p3213_p13 = por %p3212_p7, %p3211_p2 }
  0x68   : > { %p3214_p12 = pnand %p3213_p13, %p3207_p1 }
  0x6a   : > { %3217 = shalt.err (!%p3214_p12)
}
  0x6b   : > { %s4429_s24 = smov 4   ;;  %s4430_s2 = smov 64  }
  0x6c   : > { %2923 = dma.hbm_to_vmem [thread:$0]  (!%p3820_p10), %s409_s9, 1024, %s411_s3, %s3826_s6, %s4430_s2, %s4430_s2, %s4429_s24  }
  0x6d   : > { %s3556_s14 = smov [#allocation13]   ;;  %s3229_s0 = scalar_lea.vmem %s347_s21, 2048 }
  0x6e   : > { %s359_s18 = sshll.u32 %s3556_s14, 4  ;;  %p3230_p9 = scmp.ne.s32.totalorder %s347_s21, %s3229_s0  ;;  %s360_s18 = int_to_ptr.vmem [resolvable:$true] %s359_s18 }
  0x6f   : > { %p4431_p11 = pneg %p3710_p6  ;;  %p3237_p2 = scmp.lt.s32.totalorder %s347_s21, %s347_s21 }
  0x70   : > { %p3238_p1 = scmp.lt.s32.totalorder %s3229_s0, %s3229_s0 }
  0x71   : > { %p3232_p5 = pnand %p3230_p9, %p4431_p11 }
  0x72   : > { %p3239_p7 = por %p3238_p1, %p3237_p2 }
  0x73   : > { %p3233_p8 = pneg %p3232_p5 }
  0x75   : > { %p3240_p13 = pnand %p3239_p7, %p3233_p8 }
  0x77   : > { %3243 = shalt.err (!%p3240_p13)
}
  0x78   : > { %s4432_s23 = smov 8   ;;  %s4433_s4 = sld [smem:[#allocation48_spill]] }
  0x79   : > { %s3255_s30 = scalar_lea.vmem %s360_s18, 2048  ;;  %p4434_p12 = pmov %p4431_p11 }
  0x7a   : > { %p3256_p10 = scmp.ne.s32.totalorder %s360_s18, %s3255_s30  ;;  %p3263_p5 = scmp.lt.s32.totalorder %s360_s18, %s360_s18 }
  0x7b   : > { %p3264_p8 = scmp.lt.s32.totalorder %s3255_s30, %s3255_s30 }
  0x7c   : > { %p3258_p9 = pnand %p3256_p10, %p4434_p12 }
  0x7d   : > { %p3265_p2 = por %p3264_p8, %p3263_p5 }
  0x7e   : > { %2913 = dma.hbm_to_vmem [thread:$0]  (!%p3710_p6), %s4433_s4, 2048, %s347_s21, [#allocation11], %s4421_s15, %s4421_s15, %s4432_s23  }
  0x7f   : > { %p3259_p11 = pneg %p3258_p9 }
  0x81   : > { %p3266_p1 = pnand %p3265_p2, %p3259_p11 }
  0x83   : > { %3269 = shalt.err (!%p3266_p1)
}
  0x84   : > { %s4435_s5 = sld [smem:[#allocation49_spill]]  ;;  %s4383_s12 = sadd.s32 4294967294, %s3546_s27  }
  0x85   : > { %s4436_s21 = sld [smem:[#allocation39_spill]]  ;;  %s109_s20 = sadd.s32 1, %s3502_s17 }
  0x86   : > { %s4437_s13 = sld [smem:[#allocation28_spill]]  ;;  %p116_p7 = scmp.ne.s32.totalorder %s3502_s17, %s3498_s16 }
  0x87   : > { %p4439_p10 = scmp.eq.s32.totalorder %s3546_s27, 0  ;;  %p4441_p11 = scmp.eq.s32.totalorder %s3696_s28, 3 }
  0x88   : > { %p4443_p8 = scmp.eq.s32.totalorder %s3696_s28, 0  ;;  %s422_s9 = sand.u32 1, %s3502_s17  }
  0x89   : > { %p3869_p12 = por %p116_p7, %p4439_p10  ;;  %p3877_p5 = por %p4441_p11, %p116_p7 }
  0x8a   : > { %2916 = dma.hbm_to_vmem [thread:$0]  (!%p3710_p6), %s4435_s5, 2048, %s360_s18, [#allocation14], %s4421_s15, %s4421_s15, %s4432_s23  }
  0x8b   : > { %p4438_p13 = scmp.eq.s32.totalorder %s4436_s21, 0  ;;  %p262_p6 = scmp.eq.s32.totalorder %s4383_s12, 3 }
  0x8c   : > { %p122_p9 = scmp.ne.s32.totalorder %s3498_s16, %s4437_s13  ;;  %s2324_s30 = sshll.u32 %s422_s9, 7 }
  0x8d   : > { %s3865_s24 = scalar_select %p4438_p13, %s3502_s17, %s109_s20  }
  0x8e   : > { %s4442_s14 = scalar_select %p3877_p5, 1, 0 }
  0x8f   : > { %p3885_p2 = por %p122_p9, %p4443_p8  ;;  %p3890_p1 = por %p262_p6, %p122_p9 }
  0x90   : > { %s2403_s0 = sshll.u32 %s3542_s26, 11  ;;  %s4446_s13 = sld [smem:[#allocation46_spill]] }
  0x91   : > { %s4445_s3 = scalar_select %p3890_p1, 1, 0 }
  0x92   : > { %s424_s1 = scalar_lea.vmem [#allocation9], %s2324_s30  ;;  %p4447_p7 = scmp.lt.s32.totalorder %s3546_s27, 4 }
  0x93   : > { %s431_s4 = sshll.u32 %s424_s1, 4  ;;  %s4449_s22 = sld [smem:[#allocation50_spill]]  ;;  %s432_s4 = int_to_ptr.vmem [resolvable:$true] %s431_s4 }
  0x94   : > { %p3902_p13 = pnand %p4447_p7, %p3869_p12  ;;  %s445_s26 = scalar_lea.vmem [#allocation15], %s2324_s30 }
  0x95   : > { %s452_s29 = sshll.u32 %s445_s26, 4  ;;  %s3283_s8 = scalar_lea.vmem %s432_s4, 2048  ;;  %s453_s29 = int_to_ptr.vmem [resolvable:$true] %s452_s29 }
  0x96   : > { %s430_s20 = scalar_lea.hbm %s4446_s13, %s2403_s0  ;;  %p3272_p10 = pneg %p3902_p13 }
  0x97   : > { %p3284_p9 = scmp.ne.s32.totalorder %s432_s4, %s3283_s8  ;;  %s3557_s1 = smov [#allocation9]  }
  0x98   : > { %s3288_s2 = sshll.u32 %s3557_s1, 4  ;;  %s3289_s2 = int_to_ptr.vmem [resolvable:$false] %s3288_s2 }
  0x99   : > { %s3909_s9 = scalar_lea.hbm %s4449_s22, %s2403_s0  ;;  %p3286_p11 = pnand %p3284_p9, %p3272_p10 }
  0x9a   : > { %s3290_s21 = scalar_lea.vmem %s3289_s2, 4096  ;;  %p3291_p6 = scmp.lt.s32.totalorder %s432_s4, %s3289_s2 }
  0x9b   : > { %p3287_p12 = pneg %p3286_p11  ;;  %p3292_p8 = scmp.lt.s32.totalorder %s3290_s21, %s3283_s8 }
  0x9d   : > { %p3293_p7 = por %p3292_p8, %p3291_p6 }
  0x9f   : > { %p3294_p1 = pnand %p3293_p7, %p3287_p12 }
  0xa1   : > { %3297 = shalt.err (!%p3294_p1)
}
  0xa2   : > { %2926 = dma.hbm_to_vmem [thread:$0]  (!%p3902_p13), %s430_s20, 2048, %s432_s4, %s3826_s6, %s4421_s15, %s4421_s15, %s4432_s23  }
  0xa3   : > { %s3311_s5 = scalar_lea.vmem %s453_s29, 2048  ;;  %s3558_s22 = smov [#allocation15]  }
  0xa4   : > { %p3312_p9 = scmp.ne.s32.totalorder %s453_s29, %s3311_s5  ;;  %s3316_s25 = sshll.u32 %s3558_s22, 4  ;;  %s3317_s25 = int_to_ptr.vmem [resolvable:$false] %s3316_s25 }
  0xa5   : > { %s3318_s26 = scalar_lea.vmem %s3317_s25, 4096  ;;  %p3319_p1 = scmp.lt.s32.totalorder %s453_s29, %s3317_s25 }
  0xa6   : > { %p3314_p11 = pnand %p3312_p9, %p3272_p10  ;;  %p3320_p12 = scmp.lt.s32.totalorder %s3318_s26, %s3311_s5 }
  0xa8   : > { %p3315_p5 = pneg %p3314_p11  ;;  %p3321_p6 = por %p3320_p12, %p3319_p1 }
  0xaa   : > { %p3322_p8 = pnand %p3321_p6, %p3315_p5 }
  0xac   : > { %3325 = shalt.err (!%p3322_p8)
}
  0xad   : > { %2929 = dma.hbm_to_vmem [thread:$0]  (!%p3902_p13), %s3909_s9, 2048, %s453_s29, %s3785_s10, %s4421_s15, %s4421_s15, %s4432_s23  }
  0xae   : > { %464 = sbr.rel (%p3702_p4) target bundleno = 913 (0x391), region = 52  ;;  %s4451_s6 = sld [smem:[#allocation29_spill]] (!%p3702_p4) }
  0xaf   : > { %s3935_s0 = sand.u32 (!%p3702_p4), 1, %s3696_s28  }
  0xb0   : > { %s467_s8 = scalar_lea.sflag (!%p3702_p4), [#allocation5], %s3935_s0 }
  0xb4   : > { %s468_s13 = sand.u32 1, %s4451_s6  }
  0xb5   : > { %s2880_s20 = smul.u32 192, %s468_s13 }
  0xb7   : > { %s3939_s1 = scalar_lea.vmem [#allocation4], %s2880_s20 }
  0xb8   : > { %3461 = dma.done.wait (%p3754_p0), %s467_s8, 3072  }
  0xb9   : > { %3463 = vsyncadd (%p3754_p0), %s467_s8, 4294964224  ;;  %s477_s10 = sand.u32 1, %s3510_s19   ;;  %s476_s29 = scalar_lea.sflag [#allocation8], %s3935_s0 }
  0xba   : > { %s2331_s15 = sshll.u32 %s477_s10, 6 }
  0xbb   : > { %s3947_s23 = scalar_lea.vmem [#allocation7], %s2331_s15 }
  0xbc   : > { %3465 = dma.done.wait (%p3810_p3), %s476_s29, 1024  }
  0xbd   : > { %3467 = vsyncadd (%p3810_p3), %s476_s29, 4294966272  ;;  %s3954_s12 = sand.u32 1, %s3498_s16  }
  0xbe   : > { %s2332_s9 = sshll.u32 %s3954_s12, 7 }
  0xbf   : > { %s3957_s2 = scalar_lea.vmem [#allocation9], %s2332_s9 }
  0xc0   : > { %3469 = dma.done.wait (%p3885_p2), %s476_s29, 2048  }
  0xc1   : > { %3471 = vsyncadd (%p3885_p2), %s476_s29, 4294965248  ;;  %p4453_p4 = scmp.eq.s32.totalorder %s3696_s28, 0 }
  0xc3   : > { %3473 = dma.done.wait (%p4453_p4), [#allocation11], 4096   ;;  %p4454_p0 = pmov %p4453_p4 }
  0xc5   : > { %3475 = vsyncadd (%p4454_p0), [#allocation11], 4294963200  ;;  %p4455_p3 = pmov %p4454_p0 }
  0xc6   : > { %p4456_p5 = pmov %p4454_p0 }
  0xc7   : > { %3477 = dma.done.wait (%p4455_p3), [#allocation14], 2048  }
  0xc8   : > { %3479 = vsyncadd (%p4456_p5), [#allocation14], 4294965248  ;;  %s3971_s11 = scalar_lea.vmem [#allocation15], %s2332_s9 }
  0xc9   : > { %3481 = dma.done.wait (%p3885_p2), %s467_s8, 2048  }
  0xca   : > { %3483 = vsyncadd (%p3885_p2), %s467_s8, 4294965248  ;;  %s2338_s21 = sshll.u32 %s3954_s12, 6  ;;  %s3978_s5 = scalar_lea.vmem [#allocation16], %s2332_s9 }
  0xcb   : > { %s3980_s22 = scalar_lea.vmem [#allocation17], %s2338_s21  ;;  %s3982_s25 = scalar_lea.vmem [#allocation19], %s2332_s9 }
  0xcc   : > { %s4457_s26 = sld [smem:[#allocation31_spill]] }
  0xd2   : > { %p2340_p13 = scmp.ne.s32.totalorder %s4457_s26, 0 }
  0xd4   : > { %582 = sbr.rel (%p2340_p13) target bundleno = 242 (0xf2), region = 84 }
  0xd9   : > { %v3559_v0 = vmov 0.0  }
  0xda   : > { %583 = vst [vmem:[#allocation2 + $0xb0] sm:$0xff] %v3559_v0  ;;  %584 = vst [vmem:[#allocation2 + $0xd0] sm:$0xff] %v3559_v0 }
  0xdb   : > { %585 = vst [vmem:[#allocation2 + $0x10] sm:$0xff] %v3559_v0  ;;  %586 = vst [vmem:[#allocation2 + $0x48] sm:$0xff] %v3559_v0 }
  0xdc   : > { %587 = vst [vmem:[#allocation2 + $0x160] sm:$0xff] %v3559_v0  ;;  %588 = vst [vmem:[#allocation2 + $0x128] sm:$0xff] %v3559_v0 }
  0xdd   : > { %589 = vst [vmem:[#allocation2 + $0x40] sm:$0xff] %v3559_v0  ;;  %590 = vst [vmem:[#allocation2 + $0x178] sm:$0xff] %v3559_v0 }
  0xde   : > { %591 = vst [vmem:[#allocation2 + $0x108] sm:$0xff] %v3559_v0  ;;  %592 = vst [vmem:[#allocation2 + $0x110] sm:$0xff] %v3559_v0 }
  0xdf   : > { %593 = vst [vmem:[#allocation2 + $0x90] sm:$0xff] %v3559_v0  ;;  %594 = vst [vmem:[#allocation2 + $0x118] sm:$0xff] %v3559_v0 }
  0xe0   : > { %595 = vst [vmem:[#allocation2 + $0x148] sm:$0xff] %v3559_v0  ;;  %596 = vst [vmem:[#allocation2 + $0x100] sm:$0xff] %v3559_v0 }
  0xe1   : > { %597 = vst [vmem:[#allocation2 + $0x58] sm:$0xff] %v3559_v0  ;;  %598 = vst [vmem:[#allocation2 + $0xd8] sm:$0xff] %v3559_v0 }
  0xe2   : > { %599 = vst [vmem:[#allocation2 + $0x80] sm:$0xff] %v3559_v0  ;;  %600 = vst [vmem:[#allocation2 + $0x130] sm:$0xff] %v3559_v0 }
  0xe3   : > { %601 = vst [vmem:[#allocation2 + $0x138] sm:$0xff] %v3559_v0  ;;  %602 = vst [vmem:[#allocation2 + $0x120] sm:$0xff] %v3559_v0 }
  0xe4   : > { %603 = vst [vmem:[#allocation2 + $0xe0] sm:$0xff] %v3559_v0  ;;  %604 = vst [vmem:[#allocation2 + $0xa8] sm:$0xff] %v3559_v0 }
  0xe5   : > { %605 = vst [vmem:[#allocation2 + $0xb8] sm:$0xff] %v3559_v0  ;;  %606 = vst [vmem:[#allocation2 + $0x168] sm:$0xff] %v3559_v0 }
  0xe6   : > { %607 = vst [vmem:[#allocation2 + $0xe8] sm:$0xff] %v3559_v0  ;;  %608 = vst [vmem:[#allocation2 + $0xf8] sm:$0xff] %v3559_v0 }
  0xe7   : > { %609 = vst [vmem:[#allocation2 + $0x20] sm:$0xff] %v3559_v0  ;;  %610 = vst [vmem:[#allocation2 + $0x88] sm:$0xff] %v3559_v0 }
  0xe8   : > { %611 = vst [vmem:[#allocation2 + $0xa0] sm:$0xff] %v3559_v0  ;;  %612 = vst [vmem:[#allocation2 + $0x170] sm:$0xff] %v3559_v0 }
  0xe9   : > { %613 = vst [vmem:[#allocation2 + $0xf0] sm:$0xff] %v3559_v0  ;;  %614 = vst [vmem:[#allocation2 + $0x140] sm:$0xff] %v3559_v0 }
  0xea   : > { %615 = vst [vmem:[#allocation2 + $0x60] sm:$0xff] %v3559_v0  ;;  %616 = vst [vmem:[#allocation2 + $0xc8] sm:$0xff] %v3559_v0 }
  0xeb   : > { %617 = vst [vmem:[#allocation2 + $0x28] sm:$0xff] %v3559_v0  ;;  %618 = vst [vmem:[#allocation2 + $0x38] sm:$0xff] %v3559_v0 }
  0xec   : > { %619 = vst [vmem:[#allocation2 + $0xc0] sm:$0xff] %v3559_v0  ;;  %620 = vst [vmem:[#allocation2 + $0x18] sm:$0xff] %v3559_v0 }
  0xed   : > { %621 = vst [vmem:[#allocation2 + $0x98] sm:$0xff] %v3559_v0  ;;  %622 = vst [vmem:[#allocation2 + $0x8] sm:$0xff] %v3559_v0 }
  0xee   : > { %623 = vst [vmem:[#allocation2] sm:$0xff] %v3559_v0  ;;  %624 = vst [vmem:[#allocation2 + $0x78] sm:$0xff] %v3559_v0 }
  0xef   : > { %625 = vst [vmem:[#allocation2 + $0x50] sm:$0xff] %v3559_v0  ;;  %626 = vst [vmem:[#allocation2 + $0x68] sm:$0xff] %v3559_v0 }
  0xf0   : > { %627 = vst [vmem:[#allocation2 + $0x70] sm:$0xff] %v3559_v0  ;;  %628 = vst [vmem:[#allocation2 + $0x30] sm:$0xff] %v3559_v0 }
  0xf1   : > { %629 = vst [vmem:[#allocation2 + $0x158] sm:$0xff] %v3559_v0  ;;  %630 = vst [vmem:[#allocation2 + $0x150] sm:$0xff] %v3559_v0 }
  0xf2 PF: > { %v3072_v1 = vld [vmem:[%s3947_s23 + $0x38] sm:$0xff]   ;;  %v3073_v2 = vld [vmem:[%s3947_s23 + $0x30] sm:$0xff]   ;;  %v3074_v3 = vld [vmem:[%s3947_s23 + $0x28] sm:$0xff]   ;;  %s4458_s28 = sld [smem:[#allocation31_spill]] }
  0xf3   : > { %2599 = vmatprep.subr.bf16.mxu0 %v3072_v1  ;;  %2831 = vmatprep.subr.bf16.mxu1 %v3072_v1  ;;  %v3075_v4 = vld [vmem:[%s3947_s23 + $0x20] sm:$0xff]   ;;  %v3076_v7 = vld [vmem:[%s3947_s23 + $0x18] sm:$0xff]   ;;  %v3077_v8 = vld [vmem:[%s3947_s23 + $0x10] sm:$0xff]  }
  0xf4   : > { %2600 = vmatpush3.bf16.msra.mxu0 %v3072_v1  ;;  %2839 = vmatpush3.bf16.msra.mxu1 %v3072_v1  ;;  %v3080_v5 = vld [vmem:[%s3939_s1] sm:$0xff]   ;;  %v3078_v9 = vld [vmem:[%s3947_s23 + $0x8] sm:$0xff]   ;;  %v3084_v13 = vld [vmem:[%s3939_s1 + $0x10] sm:$0xff]  }
  0xf5   : > { %2601 = vmatprep.subr.bf16.mxu0 %v3073_v2  ;;  %2832 = vmatprep.subr.bf16.mxu1 %v3073_v2  ;;  %v3081_v6 = vld [vmem:[%s3939_s1 + $0x60] sm:$0xff]   ;;  %v3082_v11 = vld [vmem:[%s3939_s1 + $0x8] sm:$0xff]   ;;  %v3085_v14 = vld [vmem:[%s3939_s1 + $0x70] sm:$0xff]  }
  0xf6   : > { %2615 = vmatprep.mubr.bf16.mxu0 %v3080_v5  ;;  %2639 = vmatprep.mubr.bf16.mxu1 %v3081_v6  ;;  %v3079_v10 = vld [vmem:[%s3947_s23] sm:$0xff]   ;;  %v3083_v12 = vld [vmem:[%s3939_s1 + $0x68] sm:$0xff]   ;;  %v3086_v15 = vld [vmem:[%s3939_s1 + $0x18] sm:$0xff]  }
  0xf7   : > { %v3087_v16 = vld [vmem:[%s3939_s1 + $0x78] sm:$0xff]   ;;  %v3088_v17 = vld [vmem:[%s3939_s1 + $0x20] sm:$0xff]   ;;  %v3090_v19 = vld [vmem:[%s3939_s1 + $0x28] sm:$0xff]  }
  0xf8   : > { %2602 = vmatpush3.bf16.msra.mxu0 %v3073_v2  ;;  %2840 = vmatpush3.bf16.msra.mxu1 %v3073_v2  ;;  %v3089_v18 = vld [vmem:[%s3939_s1 + $0x80] sm:$0xff]   ;;  %v3091_v20 = vld [vmem:[%s3939_s1 + $0x88] sm:$0xff]   ;;  %v3092_v21 = vld [vmem:[%s3939_s1 + $0x30] sm:$0xff]   ;;  %p2373_p2 = scmp.ne.s32.totalorder %s4458_s28, 1 }
  0xf9   : > { %2603 = vmatprep.subr.bf16.mxu0 %v3074_v3  ;;  %2833 = vmatprep.subr.bf16.mxu1 %v3074_v3  ;;  %v3093_v22 = vld [vmem:[%s3939_s1 + $0x90] sm:$0xff]   ;;  %v3094_v23 = vld [vmem:[%s3939_s1 + $0x38] sm:$0xff]   ;;  %v3096_v25 = vld [vmem:[%s3939_s1 + $0x40] sm:$0xff]  }
  0xfa   : > { %v3095_v24 = vld [vmem:[%s3939_s1 + $0x98] sm:$0xff]   ;;  %v3097_v26 = vld [vmem:[%s3939_s1 + $0xa0] sm:$0xff]   ;;  %v3098_v27 = vld [vmem:[%s3939_s1 + $0x48] sm:$0xff]  }
  0xfb   : > { %v3099_v28 = vld [vmem:[%s3939_s1 + $0xa8] sm:$0xff]   ;;  %v3100_v29 = vld [vmem:[%s3939_s1 + $0x50] sm:$0xff]   ;;  %v3102_v31 = vld [vmem:[%s3939_s1 + $0x58] sm:$0xff]  }
  0xfc   : > { %2604 = vmatpush3.bf16.msra.mxu0 %v3074_v3  ;;  %2841 = vmatpush3.bf16.msra.mxu1 %v3074_v3  ;;  %v3101_v30 = vld [vmem:[%s3939_s1 + $0xb0] sm:$0xff]   ;;  %v3103_v32 = vld [vmem:[%s3939_s1 + $0xb8] sm:$0xff]   ;;  %v657_v34 = vld [vmem:[#allocation2 + $0x20] sm:$0xff] }
  0xfd   : > { %2605 = vmatprep.subr.bf16.mxu0 %v3075_v4  ;;  %2834 = vmatprep.subr.bf16.mxu1 %v3075_v4  ;;  %v633_v33 = vld [vmem:[#allocation2 + $0x10] sm:$0xff]  ;;  %v655_v38 = vld [vmem:[#allocation2 + $0xe8] sm:$0xff]  ;;  %v656_v50 = vld [vmem:[#allocation2 + $0xf8] sm:$0xff] }
  0xfe   : > { %v631_v37 = vld [vmem:[#allocation2 + $0xb0] sm:$0xff]  ;;  %v634_v43 = vld [vmem:[#allocation2 + $0x48] sm:$0xff]  ;;  %v637_v55 = vld [vmem:[#allocation2 + $0x40] sm:$0xff] }
  0xff   : > { %v658_v44 = vld [vmem:[#allocation2 + $0x88] sm:$0xff]  ;;  %v632_v49 = vld [vmem:[#allocation2 + $0xd0] sm:$0xff]  ;;  %v635_v61 = vld [vmem:[#allocation2 + $0x160] sm:$0xff] }
 0x100   : > { %2606 = vmatpush3.bf16.msra.mxu0 %v3075_v4  ;;  %2842 = vmatpush3.bf16.msra.mxu1 %v3075_v4  ;;  %v661_v56 = vld [vmem:[#allocation2 + $0xf0] sm:$0xff]  ;;  %v659_v62 = vld [vmem:[#allocation2 + $0xa0] sm:$0xff]  ;;  %v638_v3 = vld [vmem:[#allocation2 + $0x178] sm:$0xff] }
 0x101   : > { %2607 = vmatprep.subr.bf16.mxu0 %v3076_v7  ;;  %2835 = vmatprep.subr.bf16.mxu1 %v3076_v7  ;;  %v662_v4 = vld [vmem:[#allocation2 + $0x140] sm:$0xff] }
 0x104   : > { %2608 = vmatpush3.bf16.msra.mxu0 %v3076_v7  ;;  %2843 = vmatpush3.bf16.msra.mxu1 %v3076_v7 }
 0x105   : > { %2609 = vmatprep.subr.bf16.mxu0 %v3077_v8  ;;  %2836 = vmatprep.subr.bf16.mxu1 %v3077_v8 }
 0x108   : > { %2610 = vmatpush3.bf16.msra.mxu0 %v3077_v8  ;;  %2844 = vmatpush3.bf16.msra.mxu1 %v3077_v8 }
 0x109   : > { %2611 = vmatprep.subr.bf16.mxu0 %v3078_v9  ;;  %2837 = vmatprep.subr.bf16.mxu1 %v3078_v9 }
 0x10c   : > { %2612 = vmatpush3.bf16.msra.mxu0 %v3078_v9  ;;  %2845 = vmatpush3.bf16.msra.mxu1 %v3078_v9  ;;  %v636_v9 = vld [vmem:[#allocation2 + $0x128] sm:$0xff] }
 0x10d   : > { %2613 = vmatprep.subr.bf16.mxu0 %v3079_v10  ;;  %2838 = vmatprep.subr.bf16.mxu1 %v3079_v10 }
 0x110   : > { %2614 = vmatpush3.bf16.msra.mxu0 %v3079_v10  ;;  %2846 = vmatpush3.bf16.msra.mxu1 %v3079_v10  ;;  %v660_v10 = vld [vmem:[#allocation2 + $0x170] sm:$0xff] }
 0x113   : > { %2616 = vmatmul.mubr.bf16.vlgmr.msra.gmra.mxu0 %v3082_v11  ;;  %2640 = vmatmul.mubr.bf16.vlgmr.msra.gmra.mxu1 %v3083_v12 }
 0x114   : > { %2619 = vmatprep.mubr.bf16.mxu0 %v3084_v13  ;;  %2643 = vmatprep.mubr.bf16.mxu1 %v3085_v14 }
 0x11b   : > { %2620 = vmatmul.mubr.bf16.gmra.mxu0 %v3086_v15  ;;  %2644 = vmatmul.mubr.bf16.gmra.mxu1 %v3087_v16  ;;  %v641_v15 = vld [vmem:[#allocation2 + $0x90] sm:$0xff]  ;;  %v665_v16 = vld [vmem:[#allocation2 + $0x28] sm:$0xff] }
 0x11c   : > { %2623 = vmatprep.mubr.bf16.mxu0 %v3088_v17  ;;  %2647 = vmatprep.mubr.bf16.mxu1 %v3089_v18 }
 0x123   : > { %2624 = vmatmul.mubr.bf16.gmra.mxu0 %v3090_v19  ;;  %2648 = vmatmul.mubr.bf16.gmra.mxu1 %v3091_v20 }
 0x124   : > { %2627 = vmatprep.mubr.bf16.mxu0 %v3092_v21  ;;  %2651 = vmatprep.mubr.bf16.mxu1 %v3093_v22  ;;  %v639_v21 = vld [vmem:[#allocation2 + $0x108] sm:$0xff]  ;;  %v663_v22 = vld [vmem:[#allocation2 + $0x60] sm:$0xff] }
 0x12b   : > { %2628 = vmatmul.mubr.bf16.gmra.mxu0 %v3094_v23  ;;  %2652 = vmatmul.mubr.bf16.gmra.mxu1 %v3095_v24 }
 0x12c   : > { %2631 = vmatprep.mubr.bf16.mxu0 %v3096_v25  ;;  %2655 = vmatprep.mubr.bf16.mxu1 %v3097_v26 }
 0x133   : > { %2632 = vmatmul.mubr.bf16.gmra.mxu0 %v3098_v27  ;;  %2656 = vmatmul.mubr.bf16.gmra.mxu1 %v3099_v28  ;;  %v642_v27 = vld [vmem:[#allocation2 + $0x118] sm:$0xff] }
 0x134   : > { %2635 = vmatprep.mubr.bf16.mxu0 %v3100_v29  ;;  %2659 = vmatprep.mubr.bf16.mxu1 %v3101_v30  ;;  %v666_v28 = vld [vmem:[#allocation2 + $0x38] sm:$0xff] }
 0x13b   : > { %2636 = vmatmul.mubr.bf16.gmra.mxu0 %v3102_v31  ;;  %2660 = vmatmul.mubr.bf16.gmra.mxu1 %v3103_v32 }
 0x1d3   : > { %v2617_v35 = vpop.f32.mrf.mxu0  ;;  %v2641_v36 = vpop.f32.mrf.mxu1 }
 0x1d4   : > { %v1162_v39 = vadd.f32 %v2617_v35, %v633_v33  ;;  %v1186_v40 = vadd.f32 %v2641_v36, %v657_v34  ;;  %v640_v33 = vld [vmem:[#allocation2 + $0x110] sm:$0xff]  ;;  %v664_v34 = vld [vmem:[#allocation2 + $0xc8] sm:$0xff] }
 0x1d5   : > { %v969_v41 = vpop.f32.mrf.mxu0  ;;  %v1065_v42 = vpop.f32.mrf.mxu1 }
 0x1d6   : > { %1210 = vst [vmem:[#allocation2 + $0x10] sm:$0xff] %v1162_v39  ;;  %1234 = vst [vmem:[#allocation2 + $0x20] sm:$0xff] %v1186_v40  ;;  %v1160_v45 = vadd.f32 %v969_v41, %v631_v37  ;;  %v1184_v46 = vadd.f32 %v1065_v42, %v655_v38  ;;  %v645_v39 = vld [vmem:[#allocation2 + $0x58] sm:$0xff] }
 0x1d7   : > { %v2618_v47 = vpop.f32.mrf.mxu0  ;;  %v2642_v48 = vpop.f32.mrf.mxu1  ;;  %v669_v40 = vld [vmem:[#allocation2 + $0x98] sm:$0xff] }
 0x1d8   : > { %1208 = vst [vmem:[#allocation2 + $0xb0] sm:$0xff] %v1160_v45  ;;  %1232 = vst [vmem:[#allocation2 + $0xe8] sm:$0xff] %v1184_v46  ;;  %v1163_v51 = vadd.f32 %v2618_v47, %v634_v43  ;;  %v1187_v52 = vadd.f32 %v2642_v48, %v658_v44  ;;  %v643_v45 = vld [vmem:[#allocation2 + $0x148] sm:$0xff]  ;;  %v667_v46 = vld [vmem:[#allocation2 + $0xc0] sm:$0xff] }
 0x1d9   : > { %v972_v53 = vpop.f32.mrf.mxu0  ;;  %v1068_v54 = vpop.f32.mrf.mxu1 }
 0x1da   : > { %1211 = vst [vmem:[#allocation2 + $0x48] sm:$0xff] %v1163_v51  ;;  %1235 = vst [vmem:[#allocation2 + $0x88] sm:$0xff] %v1187_v52  ;;  %v1161_v57 = vadd.f32 %v972_v53, %v632_v49  ;;  %v1185_v58 = vadd.f32 %v1068_v54, %v656_v50  ;;  %v646_v51 = vld [vmem:[#allocation2 + $0xd8] sm:$0xff]  ;;  %v670_v52 = vld [vmem:[#allocation2 + $0x8] sm:$0xff] }
 0x1db   : > { %v2621_v59 = vpop.f32.mrf.mxu0  ;;  %v2645_v60 = vpop.f32.mrf.mxu1 }
 0x1dc   : > { %1209 = vst [vmem:[#allocation2 + $0xd0] sm:$0xff] %v1161_v57  ;;  %1233 = vst [vmem:[#allocation2 + $0xf8] sm:$0xff] %v1185_v58  ;;  %v1166_v63 = vadd.f32 %v2621_v59, %v637_v55  ;;  %v1190_v0 = vadd.f32 %v2645_v60, %v661_v56  ;;  %v644_v57 = vld [vmem:[#allocation2 + $0x100] sm:$0xff]  ;;  %v668_v58 = vld [vmem:[#allocation2 + $0x18] sm:$0xff] }
 0x1dd   : > { %v985_v1 = vpop.f32.mrf.mxu0  ;;  %v1081_v2 = vpop.f32.mrf.mxu1 }
 0x1de   : > { %1214 = vst [vmem:[#allocation2 + $0x40] sm:$0xff] %v1166_v63  ;;  %1238 = vst [vmem:[#allocation2 + $0xf0] sm:$0xff] %v1190_v0  ;;  %v1164_v5 = vadd.f32 %v985_v1, %v635_v61  ;;  %v1188_v6 = vadd.f32 %v1081_v2, %v659_v62  ;;  %v649_v63 = vld [vmem:[#allocation2 + $0x138] sm:$0xff]  ;;  %v673_v0 = vld [vmem:[#allocation2 + $0x50] sm:$0xff] }
 0x1df   : > { %v2622_v7 = vpop.f32.mrf.mxu0  ;;  %v2646_v8 = vpop.f32.mrf.mxu1 }
 0x1e0   : > { %1212 = vst [vmem:[#allocation2 + $0x160] sm:$0xff] %v1164_v5  ;;  %1236 = vst [vmem:[#allocation2 + $0xa0] sm:$0xff] %v1188_v6  ;;  %v1167_v11 = vadd.f32 %v2622_v7, %v638_v3  ;;  %v1191_v12 = vadd.f32 %v2646_v8, %v662_v4  ;;  %v647_v5 = vld [vmem:[#allocation2 + $0x80] sm:$0xff] }
 0x1e1   : > { %v988_v13 = vpop.f32.mrf.mxu0  ;;  %v1084_v14 = vpop.f32.mrf.mxu1  ;;  %v671_v6 = vld [vmem:[#allocation2] sm:$0xff] }
 0x1e2   : > { %1215 = vst [vmem:[#allocation2 + $0x178] sm:$0xff] %v1167_v11  ;;  %1239 = vst [vmem:[#allocation2 + $0x140] sm:$0xff] %v1191_v12  ;;  %v1165_v17 = vadd.f32 %v988_v13, %v636_v9  ;;  %v1189_v18 = vadd.f32 %v1084_v14, %v660_v10  ;;  %v650_v11 = vld [vmem:[#allocation2 + $0x120] sm:$0xff]  ;;  %v674_v12 = vld [vmem:[#allocation2 + $0x68] sm:$0xff] }
 0x1e3   : > { %v2625_v19 = vpop.f32.mrf.mxu0  ;;  %v2649_v20 = vpop.f32.mrf.mxu1 }
 0x1e4   : > { %1213 = vst [vmem:[#allocation2 + $0x128] sm:$0xff] %v1165_v17  ;;  %1237 = vst [vmem:[#allocation2 + $0x170] sm:$0xff] %v1189_v18  ;;  %v1170_v23 = vadd.f32 %v2625_v19, %v641_v15  ;;  %v1194_v24 = vadd.f32 %v2649_v20, %v665_v16  ;;  %v648_v17 = vld [vmem:[#allocation2 + $0x130] sm:$0xff]  ;;  %v672_v18 = vld [vmem:[#allocation2 + $0x78] sm:$0xff] }
 0x1e5   : > { %v1001_v25 = vpop.f32.mrf.mxu0  ;;  %v1097_v26 = vpop.f32.mrf.mxu1 }
 0x1e6   : > { %1218 = vst [vmem:[#allocation2 + $0x90] sm:$0xff] %v1170_v23  ;;  %1242 = vst [vmem:[#allocation2 + $0x28] sm:$0xff] %v1194_v24  ;;  %v1168_v29 = vadd.f32 %v1001_v25, %v639_v21  ;;  %v1192_v30 = vadd.f32 %v1097_v26, %v663_v22  ;;  %v653_v23 = vld [vmem:[#allocation2 + $0xb8] sm:$0xff] }
 0x1e7   : > { %v2626_v31 = vpop.f32.mrf.mxu0  ;;  %v2650_v32 = vpop.f32.mrf.mxu1  ;;  %v677_v24 = vld [vmem:[#allocation2 + $0x158] sm:$0xff] }
 0x1e8   : > { %1216 = vst [vmem:[#allocation2 + $0x108] sm:$0xff] %v1168_v29  ;;  %1240 = vst [vmem:[#allocation2 + $0x60] sm:$0xff] %v1192_v30  ;;  %v1171_v35 = vadd.f32 %v2626_v31, %v642_v27  ;;  %v1195_v36 = vadd.f32 %v2650_v32, %v666_v28  ;;  %v651_v29 = vld [vmem:[#allocation2 + $0xe0] sm:$0xff]  ;;  %v675_v30 = vld [vmem:[#allocation2 + $0x70] sm:$0xff] }
 0x1e9   : > { %v1004_v37 = vpop.f32.mrf.mxu0  ;;  %v1100_v38 = vpop.f32.mrf.mxu1 }
 0x1ea   : > { %1219 = vst [vmem:[#allocation2 + $0x118] sm:$0xff] %v1171_v35  ;;  %1243 = vst [vmem:[#allocation2 + $0x38] sm:$0xff] %v1195_v36  ;;  %v1169_v41 = vadd.f32 %v1004_v37, %v640_v33  ;;  %v1193_v42 = vadd.f32 %v1100_v38, %v664_v34  ;;  %v654_v35 = vld [vmem:[#allocation2 + $0x168] sm:$0xff]  ;;  %v678_v36 = vld [vmem:[#allocation2 + $0x150] sm:$0xff] }
 0x1eb   : > { %v2629_v43 = vpop.f32.mrf.mxu0  ;;  %v2653_v44 = vpop.f32.mrf.mxu1 }
 0x1ec   : > { %1217 = vst [vmem:[#allocation2 + $0x110] sm:$0xff] %v1169_v41  ;;  %1241 = vst [vmem:[#allocation2 + $0xc8] sm:$0xff] %v1193_v42  ;;  %v1174_v47 = vadd.f32 %v2629_v43, %v645_v39  ;;  %v1198_v48 = vadd.f32 %v2653_v44, %v669_v40  ;;  %v652_v41 = vld [vmem:[#allocation2 + $0xa8] sm:$0xff]  ;;  %v676_v42 = vld [vmem:[#allocation2 + $0x30] sm:$0xff] }
 0x1ed   : > { %v1017_v49 = vpop.f32.mrf.mxu0  ;;  %v1113_v50 = vpop.f32.mrf.mxu1 }
 0x1ee   : > { %1222 = vst [vmem:[#allocation2 + $0x58] sm:$0xff] %v1174_v47  ;;  %1246 = vst [vmem:[#allocation2 + $0x98] sm:$0xff] %v1198_v48  ;;  %v1172_v53 = vadd.f32 %v1017_v49, %v643_v45  ;;  %v1196_v54 = vadd.f32 %v1113_v50, %v667_v46 }
 0x1ef   : > { %v2630_v55 = vpop.f32.mrf.mxu0  ;;  %v2654_v56 = vpop.f32.mrf.mxu1 }
 0x1f0   : > { %1220 = vst [vmem:[#allocation2 + $0x148] sm:$0xff] %v1172_v53  ;;  %1244 = vst [vmem:[#allocation2 + $0xc0] sm:$0xff] %v1196_v54  ;;  %v1175_v59 = vadd.f32 %v2630_v55, %v646_v51  ;;  %v1199_v60 = vadd.f32 %v2654_v56, %v670_v52 }
 0x1f1   : > { %v1020_v61 = vpop.f32.mrf.mxu0  ;;  %v1116_v62 = vpop.f32.mrf.mxu1 }
 0x1f2   : > { %1223 = vst [vmem:[#allocation2 + $0xd8] sm:$0xff] %v1175_v59  ;;  %1247 = vst [vmem:[#allocation2 + $0x8] sm:$0xff] %v1199_v60  ;;  %v1173_v1 = vadd.f32 %v1020_v61, %v644_v57  ;;  %v1197_v2 = vadd.f32 %v1116_v62, %v668_v58 }
 0x1f3   : > { %v2633_v3 = vpop.f32.mrf.mxu0  ;;  %v2657_v4 = vpop.f32.mrf.mxu1 }
 0x1f4   : > { %1221 = vst [vmem:[#allocation2 + $0x100] sm:$0xff] %v1173_v1  ;;  %1245 = vst [vmem:[#allocation2 + $0x18] sm:$0xff] %v1197_v2  ;;  %v1178_v7 = vadd.f32 %v2633_v3, %v649_v63  ;;  %v1202_v8 = vadd.f32 %v2657_v4, %v673_v0 }
 0x1f5   : > { %v1033_v9 = vpop.f32.mrf.mxu0  ;;  %v1129_v10 = vpop.f32.mrf.mxu1 }
 0x1f6   : > { %1226 = vst [vmem:[#allocation2 + $0x138] sm:$0xff] %v1178_v7  ;;  %1250 = vst [vmem:[#allocation2 + $0x50] sm:$0xff] %v1202_v8  ;;  %v1176_v13 = vadd.f32 %v1033_v9, %v647_v5  ;;  %v1200_v14 = vadd.f32 %v1129_v10, %v671_v6 }
 0x1f7   : > { %v2634_v15 = vpop.f32.mrf.mxu0  ;;  %v2658_v16 = vpop.f32.mrf.mxu1 }
 0x1f8   : > { %1224 = vst [vmem:[#allocation2 + $0x80] sm:$0xff] %v1176_v13  ;;  %1248 = vst [vmem:[#allocation2] sm:$0xff] %v1200_v14  ;;  %v1179_v19 = vadd.f32 %v2634_v15, %v650_v11  ;;  %v1203_v20 = vadd.f32 %v2658_v16, %v674_v12 }
 0x1f9   : > { %v1036_v21 = vpop.f32.mrf.mxu0  ;;  %v1132_v22 = vpop.f32.mrf.mxu1 }
 0x1fa   : > { %1227 = vst [vmem:[#allocation2 + $0x120] sm:$0xff] %v1179_v19  ;;  %1251 = vst [vmem:[#allocation2 + $0x68] sm:$0xff] %v1203_v20  ;;  %v1177_v25 = vadd.f32 %v1036_v21, %v648_v17  ;;  %v1201_v26 = vadd.f32 %v1132_v22, %v672_v18 }
 0x1fb   : > { %v2637_v27 = vpop.f32.mrf.mxu0  ;;  %v2661_v28 = vpop.f32.mrf.mxu1 }
 0x1fc   : > { %1225 = vst [vmem:[#allocation2 + $0x130] sm:$0xff] %v1177_v25  ;;  %1249 = vst [vmem:[#allocation2 + $0x78] sm:$0xff] %v1201_v26  ;;  %v1182_v31 = vadd.f32 %v2637_v27, %v653_v23  ;;  %v1206_v32 = vadd.f32 %v2661_v28, %v677_v24 }
 0x1fd   : > { %v1049_v33 = vpop.f32.mrf.mxu0  ;;  %v1145_v34 = vpop.f32.mrf.mxu1 }
 0x1fe   : > { %1230 = vst [vmem:[#allocation2 + $0xb8] sm:$0xff] %v1182_v31  ;;  %1254 = vst [vmem:[#allocation2 + $0x158] sm:$0xff] %v1206_v32  ;;  %v1180_v37 = vadd.f32 %v1049_v33, %v651_v29  ;;  %v1204_v38 = vadd.f32 %v1145_v34, %v675_v30 }
 0x1ff   : > { %v2638_v39 = vpop.f32.mrf.mxu0  ;;  %v2662_v40 = vpop.f32.mrf.mxu1 }
 0x200   : > { %1228 = vst [vmem:[#allocation2 + $0xe0] sm:$0xff] %v1180_v37  ;;  %1252 = vst [vmem:[#allocation2 + $0x70] sm:$0xff] %v1204_v38  ;;  %v1183_v43 = vadd.f32 %v2638_v39, %v654_v35  ;;  %v1207_v44 = vadd.f32 %v2662_v40, %v678_v36  ;;  %1259 = sbr.rel (%p2373_p2) target bundleno = 838 (0x346), region = 88 }
 0x201   : > { %v1052_v45 = vpop.f32.mrf.mxu0  ;;  %v1148_v46 = vpop.f32.mrf.mxu1 }
 0x202   : > { %1231 = vst [vmem:[#allocation2 + $0x168] sm:$0xff] %v1183_v43  ;;  %1255 = vst [vmem:[#allocation2 + $0x150] sm:$0xff] %v1207_v44  ;;  %v1181_v47 = vadd.f32 %v1052_v45, %v652_v41  ;;  %v1205_v48 = vadd.f32 %v1148_v46, %v676_v42 }
 0x204   : > { %1229 = vst [vmem:[#allocation2 + $0xa8] sm:$0xff] %v1181_v47  ;;  %1253 = vst [vmem:[#allocation2 + $0x30] sm:$0xff] %v1205_v48 }
 0x205   : > { %v1292_v49 = vld [vmem:[#allocation2 + $0x60] sm:$0xff]  ;;  %v1293_v50 = vld [vmem:[#allocation2 + $0xc8] sm:$0xff]  ;;  %v1295_v52 = vld [vmem:[#allocation2 + $0x38] sm:$0xff]  ;;  %s4122_s18 = sld [smem:[#allocation3]] }
 0x206   : > { %v1294_v51 = vld [vmem:[#allocation2 + $0x28] sm:$0xff]  ;;  %v1296_v53 = vld [vmem:[#allocation2 + $0xc0] sm:$0xff]  ;;  %v1297_v54 = vld [vmem:[#allocation2 + $0x18] sm:$0xff]  ;;  %2001 = vst [vmem:[%s3982_s25] sm:$0xff] %v1292_v49 }
 0x207   : > { %2002 = vst [vmem:[%s3982_s25 + $0x8] sm:$0xff] %v1293_v50  ;;  %2003 = vst [vmem:[%s3982_s25 + $0x10] sm:$0xff] %v1294_v51  ;;  %v1298_v55 = vld [vmem:[#allocation2 + $0x98] sm:$0xff]  ;;  %v1299_v56 = vld [vmem:[#allocation2 + $0x8] sm:$0xff] }
 0x208   : > { %v1300_v57 = vld [vmem:[#allocation2] sm:$0xff]  ;;  %2004 = vst [vmem:[%s3982_s25 + $0x18] sm:$0xff] %v1295_v52  ;;  %2005 = vst [vmem:[%s3982_s25 + $0x20] sm:$0xff] %v1296_v53  ;;  %v1301_v58 = vld [vmem:[#allocation2 + $0x78] sm:$0xff] }
 0x209   : > { %2006 = vst [vmem:[%s3982_s25 + $0x28] sm:$0xff] %v1297_v54  ;;  %v1302_v59 = vld [vmem:[#allocation2 + $0x50] sm:$0xff]  ;;  %v1303_v60 = vld [vmem:[#allocation2 + $0x68] sm:$0xff]  ;;  %2007 = vst [vmem:[%s3982_s25 + $0x30] sm:$0xff] %v1298_v55 }
 0x20a   : > { %2008 = vst [vmem:[%s3982_s25 + $0x38] sm:$0xff] %v1299_v56  ;;  %2009 = vst [vmem:[%s3982_s25 + $0x40] sm:$0xff] %v1300_v57  ;;  %v1304_v61 = vld [vmem:[#allocation2 + $0x70] sm:$0xff]  ;;  %v1306_v63 = vld [vmem:[#allocation2 + $0x158] sm:$0xff] }
 0x20b   : > { %v1305_v62 = vld [vmem:[#allocation2 + $0x30] sm:$0xff]  ;;  %2010 = vst [vmem:[%s3982_s25 + $0x48] sm:$0xff] %v1301_v58  ;;  %2011 = vst [vmem:[%s3982_s25 + $0x50] sm:$0xff] %v1302_v59  ;;  %v1355_v1 = vld [vmem:[#allocation12 + $0x78] sm:$0xff] }
 0x20c   : > { %2012 = vst [vmem:[%s3982_s25 + $0x58] sm:$0xff] %v1303_v60  ;;  %v1307_v0 = vld [vmem:[#allocation2 + $0x150] sm:$0xff]  ;;  %2013 = vst [vmem:[%s3982_s25 + $0x60] sm:$0xff] %v1304_v61  ;;  %v1339_v2 = vld [vmem:[#allocation10 + $0x78] sm:$0xff]  ;;  %2663 = vmatprep.subr.mxu0 %v1355_v1 }
 0x20d   : > { %2014 = vst [vmem:[%s3982_s25 + $0x68] sm:$0xff] %v1305_v62  ;;  %2015 = vst [vmem:[%s3982_s25 + $0x70] sm:$0xff] %v1306_v63  ;;  %2719 = vmatprep.subr.mxu1 %v1339_v2  ;;  %v1354_v3 = vld [vmem:[#allocation12 + $0x70] sm:$0xff]  ;;  %2664 = vmatpush3.msra.mxu0 %v1355_v1  ;;  %v1353_v5 = vld [vmem:[#allocation12 + $0x68] sm:$0xff] }
 0x20e   : > { %2016 = vst [vmem:[%s3982_s25 + $0x78] sm:$0xff] %v1307_v0  ;;  %v1338_v4 = vld [vmem:[#allocation10 + $0x70] sm:$0xff]  ;;  %2720 = vmatpush3.msra.mxu1 %v1339_v2  ;;  %v1337_v6 = vld [vmem:[#allocation10 + $0x68] sm:$0xff]  ;;  %2665 = vmatprep.subr.mxu0 %v1354_v3  ;;  %v1352_v7 = vld [vmem:[#allocation12 + $0x60] sm:$0xff] }
 0x20f   : > { %2721 = vmatprep.subr.mxu1 %v1338_v4  ;;  %2666 = vmatpush3.msra.mxu0 %v1354_v3  ;;  %v1336_v8 = vld [vmem:[#allocation10 + $0x60] sm:$0xff]  ;;  %v1351_v9 = vld [vmem:[#allocation12 + $0x58] sm:$0xff]  ;;  %v1350_v11 = vld [vmem:[#allocation12 + $0x50] sm:$0xff] }
 0x210   : > { %2722 = vmatpush3.msra.mxu1 %v1338_v4  ;;  %2667 = vmatprep.subr.mxu0 %v1353_v5  ;;  %v1335_v10 = vld [vmem:[#allocation10 + $0x58] sm:$0xff]  ;;  %v1334_v12 = vld [vmem:[#allocation10 + $0x50] sm:$0xff]  ;;  %v1349_v13 = vld [vmem:[#allocation12 + $0x48] sm:$0xff] }
 0x211   : > { %2723 = vmatprep.subr.mxu1 %v1337_v6  ;;  %2668 = vmatpush3.msra.mxu0 %v1353_v5  ;;  %v1333_v14 = vld [vmem:[#allocation10 + $0x48] sm:$0xff]  ;;  %v1348_v15 = vld [vmem:[#allocation12 + $0x40] sm:$0xff]  ;;  %v1347_v17 = vld [vmem:[#allocation12 + $0x38] sm:$0xff] }
 0x212   : > { %2724 = vmatpush3.msra.mxu1 %v1337_v6  ;;  %2669 = vmatprep.subr.mxu0 %v1352_v7  ;;  %v1332_v16 = vld [vmem:[#allocation10 + $0x40] sm:$0xff]  ;;  %v1331_v18 = vld [vmem:[#allocation10 + $0x38] sm:$0xff]  ;;  %v1346_v19 = vld [vmem:[#allocation12 + $0x30] sm:$0xff] }
 0x213   : > { %2725 = vmatprep.subr.mxu1 %v1336_v8  ;;  %2670 = vmatpush3.msra.mxu0 %v1352_v7  ;;  %v1330_v20 = vld [vmem:[#allocation10 + $0x30] sm:$0xff]  ;;  %v1345_v21 = vld [vmem:[#allocation12 + $0x28] sm:$0xff]  ;;  %v1344_v23 = vld [vmem:[#allocation12 + $0x20] sm:$0xff] }
 0x214   : > { %2726 = vmatpush3.msra.mxu1 %v1336_v8  ;;  %2671 = vmatprep.subr.mxu0 %v1351_v9  ;;  %v1329_v22 = vld [vmem:[#allocation10 + $0x28] sm:$0xff]  ;;  %v1328_v24 = vld [vmem:[#allocation10 + $0x20] sm:$0xff]  ;;  %v1343_v25 = vld [vmem:[#allocation12 + $0x18] sm:$0xff] }
 0x215   : > { %2727 = vmatprep.subr.mxu1 %v1335_v10  ;;  %2672 = vmatpush3.msra.mxu0 %v1351_v9  ;;  %v1327_v26 = vld [vmem:[#allocation10 + $0x18] sm:$0xff]  ;;  %v1342_v27 = vld [vmem:[#allocation12 + $0x10] sm:$0xff]  ;;  %v1341_v29 = vld [vmem:[#allocation12 + $0x8] sm:$0xff] }
 0x216   : > { %2728 = vmatpush3.msra.mxu1 %v1335_v10  ;;  %2673 = vmatprep.subr.mxu0 %v1350_v11  ;;  %v1326_v28 = vld [vmem:[#allocation10 + $0x10] sm:$0xff]  ;;  %v1325_v30 = vld [vmem:[#allocation10 + $0x8] sm:$0xff]  ;;  %v1340_v31 = vld [vmem:[#allocation12] sm:$0xff] }
 0x217   : > { %2729 = vmatprep.subr.mxu1 %v1334_v12  ;;  %2674 = vmatpush3.msra.mxu0 %v1350_v11  ;;  %v1324_v32 = vld [vmem:[#allocation10] sm:$0xff]  ;;  %v1260_v34 = vld [vmem:[#allocation2 + $0xb0] sm:$0xff]  ;;  %v1661_v37 = vld [vmem:[#allocation13 + $0x78] sm:$0xff] }
 0x218   : > { %2730 = vmatpush3.msra.mxu1 %v1334_v12  ;;  %2675 = vmatprep.subr.mxu0 %v1349_v13  ;;  %v1276_v33 = vld [vmem:[#allocation2 + $0x80] sm:$0xff]  ;;  %v1277_v35 = vld [vmem:[#allocation2 + $0x130] sm:$0xff]  ;;  %v1278_v39 = vld [vmem:[#allocation2 + $0x138] sm:$0xff] }
 0x219   : > { %2731 = vmatprep.subr.mxu1 %v1333_v14  ;;  %2676 = vmatpush3.msra.mxu0 %v1349_v13  ;;  %v1261_v36 = vld [vmem:[#allocation2 + $0xd0] sm:$0xff]  ;;  %v1279_v41 = vld [vmem:[#allocation2 + $0x120] sm:$0xff]  ;;  %v1263_v42 = vld [vmem:[#allocation2 + $0x48] sm:$0xff] }
 0x21a   : > { %2732 = vmatpush3.msra.mxu1 %v1333_v14  ;;  %2677 = vmatprep.subr.mxu0 %v1348_v15  ;;  %v1660_v38 = vld [vmem:[#allocation13 + $0x70] sm:$0xff]  ;;  %v1659_v43 = vld [vmem:[#allocation13 + $0x68] sm:$0xff]  ;;  %v1658_v44 = vld [vmem:[#allocation13 + $0x60] sm:$0xff] }
 0x21b   : > { %2733 = vmatprep.subr.mxu1 %v1332_v16  ;;  %2678 = vmatpush3.msra.mxu0 %v1348_v15  ;;  %v1262_v40 = vld [vmem:[#allocation2 + $0x10] sm:$0xff]  ;;  %v1280_v45 = vld [vmem:[#allocation2 + $0xe0] sm:$0xff]  ;;  %v1281_v47 = vld [vmem:[#allocation2 + $0xa8] sm:$0xff] }
 0x21c   : > { %2734 = vmatpush3.msra.mxu1 %v1332_v16  ;;  %2679 = vmatprep.subr.mxu0 %v1347_v17  ;;  %v1264_v46 = vld [vmem:[#allocation2 + $0x160] sm:$0xff]  ;;  %v1265_v48 = vld [vmem:[#allocation2 + $0x128] sm:$0xff]  ;;  %v1657_v49 = vld [vmem:[#allocation13 + $0x58] sm:$0xff] }
 0x21d   : > { %2735 = vmatprep.subr.mxu1 %v1331_v18  ;;  %2680 = vmatpush3.msra.mxu0 %v1347_v17  ;;  %v1656_v50 = vld [vmem:[#allocation13 + $0x50] sm:$0xff]  ;;  %v1282_v51 = vld [vmem:[#allocation2 + $0xb8] sm:$0xff]  ;;  %v1266_v52 = vld [vmem:[#allocation2 + $0x40] sm:$0xff] }
 0x21e   : > { %2736 = vmatpush3.msra.mxu1 %v1331_v18  ;;  %2681 = vmatprep.subr.mxu0 %v1346_v19  ;;  %v1283_v53 = vld [vmem:[#allocation2 + $0x168] sm:$0xff]  ;;  %v1267_v54 = vld [vmem:[#allocation2 + $0x178] sm:$0xff]  ;;  %v1654_v56 = vld [vmem:[#allocation13 + $0x40] sm:$0xff] }
 0x21f   : > { %2737 = vmatprep.subr.mxu1 %v1330_v20  ;;  %2682 = vmatpush3.msra.mxu0 %v1346_v19  ;;  %v1655_v55 = vld [vmem:[#allocation13 + $0x48] sm:$0xff]  ;;  %v1285_v59 = vld [vmem:[#allocation2 + $0xf8] sm:$0xff]  ;;  %v1269_v60 = vld [vmem:[#allocation2 + $0x110] sm:$0xff] }
 0x220   : > { %2738 = vmatpush3.msra.mxu1 %v1330_v20  ;;  %2683 = vmatprep.subr.mxu0 %v1345_v21  ;;  %v1284_v57 = vld [vmem:[#allocation2 + $0xe8] sm:$0xff]  ;;  %v1653_v61 = vld [vmem:[#allocation13 + $0x38] sm:$0xff]  ;;  %v1652_v62 = vld [vmem:[#allocation13 + $0x30] sm:$0xff] }
 0x221   : > { %2739 = vmatprep.subr.mxu1 %v1329_v22  ;;  %2684 = vmatpush3.msra.mxu0 %v1345_v21  ;;  %v1268_v58 = vld [vmem:[#allocation2 + $0x108] sm:$0xff]  ;;  %v1286_v63 = vld [vmem:[#allocation2 + $0x20] sm:$0xff]  ;;  %v1270_v0 = vld [vmem:[#allocation2 + $0x90] sm:$0xff] }
 0x222   : > { %2740 = vmatpush3.msra.mxu1 %v1329_v22  ;;  %2685 = vmatprep.subr.mxu0 %v1344_v23  ;;  %v1287_v1 = vld [vmem:[#allocation2 + $0x88] sm:$0xff]  ;;  %v1271_v2 = vld [vmem:[#allocation2 + $0x118] sm:$0xff]  ;;  %v1650_v4 = vld [vmem:[#allocation13 + $0x20] sm:$0xff] }
 0x223   : > { %2741 = vmatprep.subr.mxu1 %v1328_v24  ;;  %2686 = vmatpush3.msra.mxu0 %v1344_v23  ;;  %v1651_v3 = vld [vmem:[#allocation13 + $0x28] sm:$0xff]  ;;  %v1288_v5 = vld [vmem:[#allocation2 + $0xa0] sm:$0xff]  ;;  %v1289_v7 = vld [vmem:[#allocation2 + $0x170] sm:$0xff] }
 0x224   : > { %2742 = vmatpush3.msra.mxu1 %v1328_v24  ;;  %2687 = vmatprep.subr.mxu0 %v1343_v25  ;;  %v1272_v6 = vld [vmem:[#allocation2 + $0x148] sm:$0xff]  ;;  %v1273_v8 = vld [vmem:[#allocation2 + $0x100] sm:$0xff]  ;;  %v1649_v9 = vld [vmem:[#allocation13 + $0x18] sm:$0xff] }
 0x225   : > { %2743 = vmatprep.subr.mxu1 %v1327_v26  ;;  %2688 = vmatpush3.msra.mxu0 %v1343_v25  ;;  %v1648_v10 = vld [vmem:[#allocation13 + $0x10] sm:$0xff]  ;;  %v1274_v12 = vld [vmem:[#allocation2 + $0x58] sm:$0xff]  ;;  %v1291_v13 = vld [vmem:[#allocation2 + $0x140] sm:$0xff] }
 0x226   : > { %2744 = vmatpush3.msra.mxu1 %v1327_v26  ;;  %2689 = vmatprep.subr.mxu0 %v1342_v27  ;;  %v1290_v11 = vld [vmem:[#allocation2 + $0xf0] sm:$0xff]  ;;  %v1275_v14 = vld [vmem:[#allocation2 + $0xd8] sm:$0xff]  ;;  %v1647_v15 = vld [vmem:[#allocation13 + $0x8] sm:$0xff] }
 0x227   : > { %2745 = vmatprep.subr.mxu1 %v1326_v28  ;;  %2690 = vmatpush3.msra.mxu0 %v1342_v27  ;;  %v1646_v16 = vld [vmem:[#allocation13] sm:$0xff]  ;;  %v4041_v19 = vld [vmem:[%s3957_s2 + $0x8] sm:$0xff]  ;;  %v4047_v21 = vld [vmem:[%s3957_s2 + $0x10] sm:$0xff] }
 0x228   : > { %2746 = vmatpush3.msra.mxu1 %v1326_v28  ;;  %2691 = vmatprep.subr.mxu0 %v1341_v29  ;;  %v4035_v17 = vld [vmem:[%s3957_s2] sm:$0xff]  ;;  %v4044_v20 = vld [vmem:[%s3957_s2 + $0x48] sm:$0xff]  ;;  %v4050_v22 = vld [vmem:[%s3957_s2 + $0x50] sm:$0xff] }
 0x229   : > { %2747 = vmatprep.subr.mxu1 %v1325_v30  ;;  %2692 = vmatpush3.msra.mxu0 %v1341_v29  ;;  %v4038_v18 = vld [vmem:[%s3957_s2 + $0x40] sm:$0xff]  ;;  %v4059_v23 = vld [vmem:[%s3957_s2 + $0x18] sm:$0xff]  ;;  %v4075_v27 = vld [vmem:[%s3957_s2 + $0x28] sm:$0xff] }
 0x22a   : > { %2748 = vmatpush3.msra.mxu1 %v1325_v30  ;;  %2693 = vmatprep.subr.mxu0 %v1340_v31  ;;  %v4062_v24 = vld [vmem:[%s3957_s2 + $0x58] sm:$0xff]  ;;  %v4065_v25 = vld [vmem:[%s3957_s2 + $0x20] sm:$0xff]  ;;  %v4078_v28 = vld [vmem:[%s3957_s2 + $0x68] sm:$0xff] }
 0x22b   : > { %2749 = vmatprep.subr.mxu1 %v1324_v32  ;;  %2694 = vmatpush3.msra.mxu0 %v1340_v31  ;;  %v4068_v26 = vld [vmem:[%s3957_s2 + $0x60] sm:$0xff]  ;;  %v4081_v29 = vld [vmem:[%s3957_s2 + $0x30] sm:$0xff]  ;;  %v4091_v31 = vld [vmem:[%s3957_s2 + $0x38] sm:$0xff] }
 0x22c   : > { %2695 = vmatprep.mubr.f32.mxu0 %v1276_v33  ;;  %2750 = vmatpush3.msra.mxu1 %v1324_v32  ;;  %4459 = vst [vmem:[#allocation42_spill] sm:$0xff] %v4081_v29  ;;  %v4084_v30 = vld [vmem:[%s3957_s2 + $0x70] sm:$0xff]  ;;  %v4094_v32 = vld [vmem:[%s3957_s2 + $0x78] sm:$0xff] }
 0x22d   : > { %2751 = vmatprep.mubr.f32.mxu1 %v1260_v34  ;;  %2696 = vmatmul.mubr.f32.vlgmr.msra.gmra.mxu0 %v1277_v35  ;;  %4460 = vst [vmem:[#allocation43_spill] sm:$0xff] %v4084_v30 }
 0x22e   : > { %2752 = vmatmul.mubr.f32.vlgmr.msra.gmra.mxu1 %v1261_v36  ;;  %2775 = vmatprep.subr.mxu0 %v1661_v37 }
 0x22f   : > { %2847 = vmatprep.subr.mxu1 %v1661_v37  ;;  %2776 = vmatpush3.msra.mxu0 %v1661_v37 }
 0x230   : > { %2863 = vmatpush3.msra.mxu1 %v1661_v37  ;;  %2777 = vmatprep.subr.mxu0 %v1660_v38 }
 0x231   : > { %2848 = vmatprep.subr.mxu1 %v1660_v38  ;;  %2698 = vmatprep.mubr.f32.mxu0 %v1278_v39 }
 0x232   : > { %2754 = vmatprep.mubr.f32.mxu1 %v1262_v40  ;;  %2778 = vmatpush3.msra.mxu0 %v1660_v38 }
 0x233   : > { %2864 = vmatpush3.msra.mxu1 %v1660_v38  ;;  %2699 = vmatmul.mubr.f32.gmra.mxu0 %v1279_v41 }
 0x234   : > { %2755 = vmatmul.mubr.f32.gmra.mxu1 %v1263_v42  ;;  %2779 = vmatprep.subr.mxu0 %v1659_v43 }
 0x235   : > { %2849 = vmatprep.subr.mxu1 %v1659_v43  ;;  %2780 = vmatpush3.msra.mxu0 %v1659_v43 }
 0x236   : > { %2865 = vmatpush3.msra.mxu1 %v1659_v43  ;;  %2781 = vmatprep.subr.mxu0 %v1658_v44 }
 0x237   : > { %2850 = vmatprep.subr.mxu1 %v1658_v44  ;;  %2701 = vmatprep.mubr.f32.mxu0 %v1280_v45 }
 0x238   : > { %2757 = vmatprep.mubr.f32.mxu1 %v1264_v46  ;;  %2782 = vmatpush3.msra.mxu0 %v1658_v44 }
 0x239   : > { %2866 = vmatpush3.msra.mxu1 %v1658_v44  ;;  %2702 = vmatmul.mubr.f32.gmra.mxu0 %v1281_v47 }
 0x23a   : > { %2758 = vmatmul.mubr.f32.gmra.mxu1 %v1265_v48  ;;  %2783 = vmatprep.subr.mxu0 %v1657_v49 }
 0x23b   : > { %2851 = vmatprep.subr.mxu1 %v1657_v49  ;;  %2784 = vmatpush3.msra.mxu0 %v1657_v49 }
 0x23c   : > { %2867 = vmatpush3.msra.mxu1 %v1657_v49  ;;  %2785 = vmatprep.subr.mxu0 %v1656_v50 }
 0x23d   : > { %2852 = vmatprep.subr.mxu1 %v1656_v50  ;;  %2704 = vmatprep.mubr.f32.mxu0 %v1282_v51 }
 0x23e   : > { %2760 = vmatprep.mubr.f32.mxu1 %v1266_v52  ;;  %2786 = vmatpush3.msra.mxu0 %v1656_v50 }
 0x23f   : > { %2868 = vmatpush3.msra.mxu1 %v1656_v50  ;;  %2705 = vmatmul.mubr.f32.gmra.mxu0 %v1283_v53 }
 0x240   : > { %2761 = vmatmul.mubr.f32.gmra.mxu1 %v1267_v54  ;;  %2787 = vmatprep.subr.mxu0 %v1655_v55 }
 0x241   : > { %2853 = vmatprep.subr.mxu1 %v1655_v55  ;;  %2788 = vmatpush3.msra.mxu0 %v1655_v55 }
 0x242   : > { %2869 = vmatpush3.msra.mxu1 %v1655_v55  ;;  %2789 = vmatprep.subr.mxu0 %v1654_v56 }
 0x243   : > { %2854 = vmatprep.subr.mxu1 %v1654_v56  ;;  %2707 = vmatprep.mubr.f32.mxu0 %v1284_v57 }
 0x244   : > { %2763 = vmatprep.mubr.f32.mxu1 %v1268_v58  ;;  %2790 = vmatpush3.msra.mxu0 %v1654_v56 }
 0x245   : > { %2870 = vmatpush3.msra.mxu1 %v1654_v56  ;;  %2708 = vmatmul.mubr.f32.gmra.mxu0 %v1285_v59 }
 0x246   : > { %2764 = vmatmul.mubr.f32.gmra.mxu1 %v1269_v60  ;;  %2791 = vmatprep.subr.mxu0 %v1653_v61 }
 0x247   : > { %2855 = vmatprep.subr.mxu1 %v1653_v61  ;;  %2792 = vmatpush3.msra.mxu0 %v1653_v61 }
 0x248   : > { %2871 = vmatpush3.msra.mxu1 %v1653_v61  ;;  %2793 = vmatprep.subr.mxu0 %v1652_v62 }
 0x249   : > { %2856 = vmatprep.subr.mxu1 %v1652_v62  ;;  %2710 = vmatprep.mubr.f32.mxu0 %v1286_v63 }
 0x24a   : > { %2766 = vmatprep.mubr.f32.mxu1 %v1270_v0  ;;  %2794 = vmatpush3.msra.mxu0 %v1652_v62 }
 0x24b   : > { %2872 = vmatpush3.msra.mxu1 %v1652_v62  ;;  %2711 = vmatmul.mubr.f32.gmra.mxu0 %v1287_v1 }
 0x24c   : > { %2767 = vmatmul.mubr.f32.gmra.mxu1 %v1271_v2  ;;  %2795 = vmatprep.subr.mxu0 %v1651_v3 }
 0x24d   : > { %2857 = vmatprep.subr.mxu1 %v1651_v3  ;;  %2796 = vmatpush3.msra.mxu0 %v1651_v3 }
 0x24e   : > { %2873 = vmatpush3.msra.mxu1 %v1651_v3  ;;  %2797 = vmatprep.subr.mxu0 %v1650_v4 }
 0x24f   : > { %2858 = vmatprep.subr.mxu1 %v1650_v4  ;;  %2713 = vmatprep.mubr.f32.mxu0 %v1288_v5 }
 0x250   : > { %2769 = vmatprep.mubr.f32.mxu1 %v1272_v6  ;;  %2798 = vmatpush3.msra.mxu0 %v1650_v4  ;;  %v1832_v6 = vld [vmem:[%s3971_s11 + $0x48] sm:$0xff] }
 0x251   : > { %2874 = vmatpush3.msra.mxu1 %v1650_v4  ;;  %2714 = vmatmul.mubr.f32.gmra.mxu0 %v1289_v7  ;;  %v1824_v4 = vld [vmem:[%s3971_s11 + $0x8] sm:$0xff] }
 0x252   : > { %2770 = vmatmul.mubr.f32.gmra.mxu1 %v1273_v8  ;;  %2799 = vmatprep.subr.mxu0 %v1649_v9 }
 0x253   : > { %2859 = vmatprep.subr.mxu1 %v1649_v9  ;;  %2800 = vmatpush3.msra.mxu0 %v1649_v9 }
 0x254   : > { %2875 = vmatpush3.msra.mxu1 %v1649_v9  ;;  %2801 = vmatprep.subr.mxu0 %v1648_v10 }
 0x255   : > { %2860 = vmatprep.subr.mxu1 %v1648_v10  ;;  %2716 = vmatprep.mubr.f32.mxu0 %v1290_v11 }
 0x256   : > { %2772 = vmatprep.mubr.f32.mxu1 %v1274_v12  ;;  %2802 = vmatpush3.msra.mxu0 %v1648_v10 }
 0x257   : > { %2876 = vmatpush3.msra.mxu1 %v1648_v10  ;;  %2717 = vmatmul.mubr.f32.gmra.mxu0 %v1291_v13  ;;  %v1823_v13 = vld [vmem:[%s3971_s11] sm:$0xff] }
 0x258   : > { %2773 = vmatmul.mubr.f32.gmra.mxu1 %v1275_v14  ;;  %2803 = vmatprep.subr.mxu0 %v1647_v15 }
 0x259   : > { %2861 = vmatprep.subr.mxu1 %v1647_v15  ;;  %2804 = vmatpush3.msra.mxu0 %v1647_v15 }
 0x25a   : > { %2877 = vmatpush3.msra.mxu1 %v1647_v15  ;;  %2805 = vmatprep.subr.mxu0 %v1646_v16  ;;  %v1831_v15 = vld [vmem:[%s3971_s11 + $0x40] sm:$0xff] }
 0x25b   : > { %2862 = vmatprep.subr.mxu1 %v1646_v16  ;;  %2806 = vmatpush3.msra.mxu0 %v1646_v16 }
 0x25c   : > { %2878 = vmatpush3.msra.mxu1 %v1646_v16  ;;  %2807 = vmatprep.mubr.f32.mxu0 %v4035_v17 }
 0x25d   : > { %2819 = vmatprep.mubr.f32.mxu1 %v4038_v18  ;;  %2808 = vmatmul.mubr.f32.vlgmr.msra.gmra.mxu0 %v4041_v19 }
 0x25e   : > { %2820 = vmatmul.mubr.f32.vlgmr.msra.gmra.mxu1 %v4044_v20  ;;  %2810 = vmatprep.mubr.f32.mxu0 %v4047_v21 }
 0x25f   : > { %2822 = vmatprep.mubr.f32.mxu1 %v4050_v22 }
 0x261   : > { %2811 = vmatmul.mubr.f32.gmra.mxu0 %v4059_v23 }
 0x262   : > { %2823 = vmatmul.mubr.f32.gmra.mxu1 %v4062_v24  ;;  %2813 = vmatprep.mubr.f32.mxu0 %v4065_v25 }
 0x263   : > { %2825 = vmatprep.mubr.f32.mxu1 %v4068_v26 }
 0x265   : > { %2814 = vmatmul.mubr.f32.gmra.mxu0 %v4075_v27 }
 0x266   : > { %2826 = vmatmul.mubr.f32.gmra.mxu1 %v4078_v28  ;;  %2816 = vmatprep.mubr.f32.mxu0 %v4081_v29 }
 0x267   : > { %2828 = vmatprep.mubr.f32.mxu1 %v4084_v30 }
 0x269   : > { %2817 = vmatmul.mubr.f32.gmra.mxu0 %v4091_v31 }
 0x26a   : > { %2829 = vmatmul.mubr.f32.gmra.mxu1 %v4094_v32 }
 0x2ed   : > { %v2697_v33 = vpop.f32.mrf.mxu0 }
 0x2ee   : > { %v2753_v34 = vpop.f32.mrf.mxu1 }
 0x2ef   : > { %v1422_v35 = vpop.f32.mrf.mxu0  ;;  %v1573_v1 = vadd.f32 %v2753_v34, %v2697_v33 }
 0x2f0   : > { %v1567_v36 = vpop.f32.mrf.mxu1 }
 0x2f1   : > { %v1568_v7 = vadd.f32 %v1567_v36, %v1422_v35  ;;  %v1826_v36 = vld [vmem:[%s3971_s11 + $0x18] sm:$0xff] }
 0x2f3   : > { %v2700_v37 = vpop.f32.mrf.mxu0 }
 0x2f4   : > { %v2756_v38 = vpop.f32.mrf.mxu1 }
 0x2f5   : > { %v1432_v39 = vpop.f32.mrf.mxu0  ;;  %v1583_v11 = vadd.f32 %v2756_v38, %v2700_v37 }
 0x2f6   : > { %v1577_v40 = vpop.f32.mrf.mxu1 }
 0x2f7   : > { %v1578_v34 = vadd.f32 %v1577_v40, %v1432_v39  ;;  %v1833_v40 = vld [vmem:[%s3971_s11 + $0x50] sm:$0xff] }
 0x2f9   : > { %v2703_v41 = vpop.f32.mrf.mxu0 }
 0x2fa   : > { %v2759_v42 = vpop.f32.mrf.mxu1 }
 0x2fb   : > { %v1442_v43 = vpop.f32.mrf.mxu0 }
 0x2fc   : > { %v1587_v44 = vpop.f32.mrf.mxu1 }
 0x2ff   : > { %v4098_v45 = vpop.f32.mrf.mxu0 }
 0x300   : > { %v4100_v46 = vpop.f32.mrf.mxu1 }
 0x301   : > { %v4102_v47 = vpop.f32.mrf.mxu0 }
 0x302   : > { %v4104_v48 = vpop.f32.mrf.mxu1 }
 0x305   : > { %v2709_v49 = vpop.f32.mrf.mxu0 }
 0x306   : > { %v2765_v50 = vpop.f32.mrf.mxu1 }
 0x307   : > { %v1462_v51 = vpop.f32.mrf.mxu0  ;;  %v1613_v2 = vadd.f32 %v2765_v50, %v2709_v49 }
 0x308   : > { %v1607_v52 = vpop.f32.mrf.mxu1 }
 0x309   : > { %v1608_v8 = vadd.f32 %v1607_v52, %v1462_v51 }
 0x30b   : > { %v2712_v53 = vpop.f32.mrf.mxu0 }
 0x30c   : > { %v2768_v54 = vpop.f32.mrf.mxu1 }
 0x30d   : > { %v1472_v55 = vpop.f32.mrf.mxu0  ;;  %v1623_v49 = vadd.f32 %v2768_v54, %v2712_v53 }
 0x30e   : > { %v1617_v56 = vpop.f32.mrf.mxu1 }
 0x30f   : > { %v1618_v50 = vadd.f32 %v1617_v56, %v1472_v55 }
 0x311   : > { %v2715_v57 = vpop.f32.mrf.mxu0 }
 0x312   : > { %v2771_v58 = vpop.f32.mrf.mxu1 }
 0x313   : > { %v1482_v59 = vpop.f32.mrf.mxu0  ;;  %v1633_v56 = vadd.f32 %v2771_v58, %v2715_v57  ;;  %v1598_v57 = vadd.f32 %v4104_v48, %v4102_v47  ;;  %v1830_v48 = vld [vmem:[%s3971_s11 + $0x38] sm:$0xff] }
 0x314   : > { %v1627_v60 = vpop.f32.mrf.mxu1 }
 0x317   : > { %v4106_v61 = vpop.f32.mrf.mxu0 }
 0x318   : > { %v4108_v62 = vpop.f32.mrf.mxu1 }
 0x319   : > { %v4110_v63 = vpop.f32.mrf.mxu0 }
 0x31a   : > { %v4112_v0 = vpop.f32.mrf.mxu1 }
 0x31d   : > { %v2809_v3 = vpop.f32.mrf.mxu0 }
 0x31e   : > { %v2821_v5 = vpop.f32.mrf.mxu1  ;;  %v1808_v9 = vadd.f32 %v2809_v3, %v1573_v1  ;;  %v1834_v1 = vld [vmem:[%s3971_s11 + $0x58] sm:$0xff]  ;;  %v1588_v3 = vadd.f32 %v1587_v44, %v1442_v43 }
 0x31f   : > { %v1816_v10 = vadd.f32 %v2821_v5, %v1613_v2  ;;  %v1728_v12 = vpop.f32.mrf.mxu0  ;;  %v1593_v2 = vadd.f32 %v2759_v42, %v2703_v41  ;;  %v1828_v41 = vld [vmem:[%s3971_s11 + $0x28] sm:$0xff] }
 0x320   : > { %v1768_v14 = vpop.f32.mrf.mxu1  ;;  %v1840_v16 = vadd.f32 %v1824_v4, %v1808_v9  ;;  %v1807_v29 = vadd.f32 %v1728_v12, %v1568_v7  ;;  %v1628_v7 = vadd.f32 %v1627_v60, %v1482_v59  ;;  %v1836_v9 = vld [vmem:[%s3971_s11 + $0x68] sm:$0xff]  ;;  %v1827_v60 = vld [vmem:[%s3971_s11 + $0x20] sm:$0xff] }
 0x321   : > { %v1848_v30 = vadd.f32 %v1832_v6, %v1816_v10  ;;  %v1815_v33 = vadd.f32 %v1768_v14, %v1608_v8  ;;  %v2812_v35 = vpop.f32.mrf.mxu0  ;;  %v1825_v6 = vld [vmem:[%s3971_s11 + $0x10] sm:$0xff]  ;;  %v1603_v10 = vadd.f32 %v4100_v46, %v4098_v45  ;;  %v1835_v12 = vld [vmem:[%s3971_s11 + $0x60] sm:$0xff]  ;;  %v1638_v45 = vadd.f32 %v4112_v0, %v4110_v63 }
 0x322   : > { %v2824_v51 = vpop.f32.mrf.mxu1  ;;  %3104 = vtanh.f32 %v1840_v16  ;;  %v1839_v52 = vadd.f32 %v1823_v13, %v1807_v29  ;;  %v1810_v38 = vadd.f32 %v2812_v35, %v1583_v11  ;;  %v1643_v16 = vadd.f32 %v4108_v62, %v4106_v61  ;;  %v1838_v35 = vld [vmem:[%s3971_s11 + $0x78] sm:$0xff]  ;;  %v1837_v62 = vld [vmem:[%s3971_s11 + $0x70] sm:$0xff] }
 0x323   : > { %v1847_v37 = vadd.f32 %v1831_v15, %v1815_v33  ;;  %3106 = vtanh.f32 %v1848_v30  ;;  %v1818_v4 = vadd.f32 %v2824_v51, %v1623_v49  ;;  %v1738_v5 = vpop.f32.mrf.mxu0 }
 0x324   : > { %v1778_v39 = vpop.f32.mrf.mxu1  ;;  %3108 = vtanh.f32 %v1839_v52  ;;  %v1842_v53 = vadd.f32 %v1826_v36, %v1810_v38  ;;  %v1809_v54 = vadd.f32 %v1738_v5, %v1578_v34  ;;  %v1829_v52 = vld [vmem:[%s3971_s11 + $0x30] sm:$0xff]  ;;  %v4141_v38 = vstv %s4122_s18 }
 0x325   : > { %v1817_v55 = vadd.f32 %v1778_v39, %v1618_v50  ;;  %3110 = vtanh.f32 %v1847_v37  ;;  %v1850_v29 = vadd.f32 %v1834_v1, %v1818_v4  ;;  %v2815_v30 = vpop.f32.mrf.mxu0 }
 0x326   : > { %v2827_v42 = vpop.f32.mrf.mxu1  ;;  %3112 = vtanh.f32 %v1842_v53  ;;  %v1841_v43 = vadd.f32 %v1825_v6, %v1809_v54  ;;  %v1812_v8 = vadd.f32 %v2815_v30, %v1593_v2 }
 0x327   : > { %v1849_v44 = vadd.f32 %v1833_v40, %v1817_v55  ;;  %3114 = vtanh.f32 %v1850_v29  ;;  %v1820_v58 = vadd.f32 %v2827_v42, %v1633_v56  ;;  %v1748_v59 = vpop.f32.mrf.mxu0 }
 0x328   : > { %v1788_v11 = vpop.f32.mrf.mxu1  ;;  %3116 = vtanh.f32 %v1841_v43  ;;  %v1844_v13 = vadd.f32 %v1828_v41, %v1812_v8  ;;  %v1811_v14 = vadd.f32 %v1748_v59, %v1588_v3 }
 0x329   : > { %v1819_v15 = vadd.f32 %v1788_v11, %v1628_v7  ;;  %3118 = vtanh.f32 %v1849_v44  ;;  %v1852_v46 = vadd.f32 %v1836_v9, %v1820_v58  ;;  %v2818_v47 = vpop.f32.mrf.mxu0 }
 0x32a   : > { %v2830_v33 = vpop.f32.mrf.mxu1  ;;  %3120 = vtanh.f32 %v1844_v13  ;;  %v1843_v34 = vadd.f32 %v1827_v60, %v1811_v14  ;;  %v1814_v50 = vadd.f32 %v2818_v47, %v1603_v10 }
 0x32b   : > { %v1851_v49 = vadd.f32 %v1835_v12, %v1819_v15  ;;  %3122 = vtanh.f32 %v1852_v46  ;;  %v1822_v36 = vadd.f32 %v2830_v33, %v1643_v16  ;;  %v1758_v51 = vpop.f32.mrf.mxu0 }
 0x32c   : > { %v1798_v61 = vpop.f32.mrf.mxu1  ;;  %3124 = vtanh.f32 %v1843_v34  ;;  %v1846_v63 = vadd.f32 %v1830_v48, %v1814_v50  ;;  %v1813_v0 = vadd.f32 %v1758_v51, %v1598_v57 }
 0x32d   : > { %v1821_v37 = vadd.f32 %v1798_v61, %v1638_v45  ;;  %3126 = vtanh.f32 %v1851_v49  ;;  %v1854_v1 = vadd.f32 %v1838_v35, %v1822_v36 }
 0x32e   : > { %3128 = vtanh.f32 %v1846_v63  ;;  %v1845_v2 = vadd.f32 %v1829_v52, %v1813_v0 }
 0x32f   : > { %v1853_v3 = vadd.f32 %v1837_v62, %v1821_v37  ;;  %v3105_v4 = vpop.eup %3104  ;;  %3130 = vtanh.f32 %v1854_v1  ;;  %v4462_v62 = vld [vmem:[#allocation43_spill] sm:$0xff] }
 0x330   : > { %v3107_v5 = vpop.eup %3106  ;;  %v1874_v6 = vmul.f32 %v3105_v4, %v4141_v38  ;;  %3132 = vtanh.f32 %v1845_v2 }
 0x331   : > { %v3109_v39 = vpop.eup %3108  ;;  %v1882_v40 = vmul.f32 %v3107_v5, %v4141_v38  ;;  %3134 = vtanh.f32 %v1853_v3 }
 0x332   : > { %v3111_v53 = vpop.eup %3110  ;;  %v1890_v54 = vadd.f32 %v1874_v6, %v4041_v19  ;;  %v1873_v55 = vmul.f32 %v3109_v39, %v4141_v38 }
 0x333   : > { %v3113_v56 = vpop.eup %3112  ;;  %v1898_v7 = vadd.f32 %v1882_v40, %v4044_v20  ;;  %v1881_v29 = vmul.f32 %v3111_v53, %v4141_v38 }
 0x334   : > { %v3115_v30 = vpop.eup %3114  ;;  %1906 = vst [vmem:[%s3978_s5 + $0x8] sm:$0xff] %v1890_v54  ;;  %v1889_v41 = vadd.f32 %v1873_v55, %v4035_v17  ;;  %v1876_v42 = vmul.f32 %v3113_v56, %v4141_v38 }
 0x335   : > { %v3117_v43 = vpop.eup %3116  ;;  %1914 = vst [vmem:[%s3978_s5 + $0x48] sm:$0xff] %v1898_v7  ;;  %v1897_v19 = vadd.f32 %v1881_v29, %v4038_v18  ;;  %v1884_v44 = vmul.f32 %v3115_v30, %v4141_v38 }
 0x336   : > { %v3119_v8 = vpop.eup %3118  ;;  %1905 = vst [vmem:[%s3978_s5] sm:$0xff] %v1889_v41  ;;  %v2427_v20 = vpack.c.bf16 %v1890_v54, %v1889_v41  ;;  %v1892_v9 = vadd.f32 %v1876_v42, %v4059_v23  ;;  %v1875_v10 = vmul.f32 %v3117_v43, %v4141_v38 }
 0x337   : > { %v3121_v17 = vpop.eup %3120  ;;  %1913 = vst [vmem:[%s3978_s5 + $0x40] sm:$0xff] %v1897_v19  ;;  %v2447_v57 = vpack.c.bf16 %v1898_v7, %v1897_v19  ;;  %v1900_v58 = vadd.f32 %v1884_v44, %v4062_v24  ;;  %v1883_v59 = vmul.f32 %v3119_v8, %v4141_v38 }
 0x338   : > { %v3123_v18 = vpop.eup %3122  ;;  %2428 = vst [vmem:[%s3980_s22] sm:$0xff] %v2427_v20   ;;  %1908 = vst [vmem:[%s3978_s5 + $0x18] sm:$0xff] %v1892_v9  ;;  %v1891_v60 = vadd.f32 %v1875_v10, %v4047_v21  ;;  %v1878_v11 = vmul.f32 %v3121_v17, %v4141_v38 }
 0x339   : > { %v3125_v12 = vpop.eup %3124  ;;  %2467 = vst [vmem:[%s3980_s22 + $0x20] sm:$0xff] %v2447_v57   ;;  %1916 = vst [vmem:[%s3978_s5 + $0x58] sm:$0xff] %v1900_v58  ;;  %v1899_v23 = vadd.f32 %v1883_v59, %v4050_v22  ;;  %v1886_v13 = vmul.f32 %v3123_v18, %v4141_v38 }
 0x33a   : > { %v3127_v24 = vpop.eup %3126  ;;  %1907 = vst [vmem:[%s3978_s5 + $0x10] sm:$0xff] %v1891_v60  ;;  %v2432_v14 = vpack.c.bf16 %v1892_v9, %v1891_v60  ;;  %v1894_v15 = vadd.f32 %v1878_v11, %v4075_v27  ;;  %v1877_v21 = vmul.f32 %v3125_v12, %v4141_v38 }
 0x33b   : > { %v3129_v16 = vpop.eup %3128  ;;  %1915 = vst [vmem:[%s3978_s5 + $0x50] sm:$0xff] %v1899_v23  ;;  %v2452_v45 = vpack.c.bf16 %v1900_v58, %v1899_v23  ;;  %v1902_v46 = vadd.f32 %v1886_v13, %v4078_v28  ;;  %v1885_v47 = vmul.f32 %v3127_v24, %v4141_v38 }
 0x33c   : > { %v3131_v22 = vpop.eup %3130  ;;  %2464 = vst [vmem:[%s3980_s22 + $0x8] sm:$0xff] %v2432_v14   ;;  %1910 = vst [vmem:[%s3978_s5 + $0x28] sm:$0xff] %v1894_v15  ;;  %v1893_v48 = vadd.f32 %v1877_v21, %v4065_v25  ;;  %v1880_v33 = vmul.f32 %v3129_v16, %v4141_v38 }
 0x33d   : > { %v3133_v27 = vpop.eup %3132  ;;  %2468 = vst [vmem:[%s3980_s22 + $0x28] sm:$0xff] %v2452_v45   ;;  %1918 = vst [vmem:[%s3978_s5 + $0x68] sm:$0xff] %v1902_v46  ;;  %v1901_v34 = vadd.f32 %v1885_v47, %v4068_v26  ;;  %v1888_v28 = vmul.f32 %v3131_v22, %v4141_v38  ;;  %v4461_v26 = vld [vmem:[#allocation42_spill] sm:$0xff] }
 0x33e   : > { %v3135_v49 = vpop.eup %3134  ;;  %1909 = vst [vmem:[%s3978_s5 + $0x20] sm:$0xff] %v1893_v48  ;;  %v2437_v50 = vpack.c.bf16 %v1894_v15, %v1893_v48  ;;  %v1896_v25 = vadd.f32 %v1880_v33, %v4091_v31  ;;  %v1879_v35 = vmul.f32 %v3133_v27, %v4141_v38 }
 0x33f   : > { %1917 = vst [vmem:[%s3978_s5 + $0x60] sm:$0xff] %v1901_v34  ;;  %v2457_v36 = vpack.c.bf16 %v1902_v46, %v1901_v34  ;;  %v1904_v51 = vadd.f32 %v1888_v28, %v4094_v32  ;;  %v1887_v52 = vmul.f32 %v3135_v49, %v4141_v38 }
 0x340   : > { %2465 = vst [vmem:[%s3980_s22 + $0x10] sm:$0xff] %v2437_v50   ;;  %1912 = vst [vmem:[%s3978_s5 + $0x38] sm:$0xff] %v1896_v25  ;;  %v1895_v61 = vadd.f32 %v1879_v35, %v4461_v26 }
 0x341   : > { %2469 = vst [vmem:[%s3980_s22 + $0x30] sm:$0xff] %v2457_v36   ;;  %1920 = vst [vmem:[%s3978_s5 + $0x78] sm:$0xff] %v1904_v51  ;;  %v1903_v63 = vadd.f32 %v1887_v52, %v4462_v62 }
 0x342   : > { %1911 = vst [vmem:[%s3978_s5 + $0x30] sm:$0xff] %v1895_v61  ;;  %v2442_v31 = vpack.c.bf16 %v1896_v25, %v1895_v61 }
 0x343   : > { %1919 = vst [vmem:[%s3978_s5 + $0x70] sm:$0xff] %v1903_v63  ;;  %v2462_v0 = vpack.c.bf16 %v1904_v51, %v1903_v63 }
 0x344   : > { %2466 = vst [vmem:[%s3980_s22 + $0x18] sm:$0xff] %v2442_v31  }
 0x345   : > { %2470 = vst [vmem:[%s3980_s22 + $0x38] sm:$0xff] %v2462_v0  }
 0x346 PF: > { %s4463_s4 = sld [smem:[#allocation32_spill]]  ;;  %s2057_s10 = sshll.u32 %s3980_s22, 4  ;;  %s4206_s10 = int_to_ptr.vmem [resolvable:$true] %s2057_s10 }
 0x347   : > { %s4464_s20 = sld [smem:[#allocation52_spill]]  ;;  %s2023_s15 = scalar_lea.sflag [#allocation18], %s3935_s0 }
 0x348   : > { %s3326_s29 = scalar_lea.vmem %s4206_s10, 1024  ;;  %p4466_p7 = scmp.ne.s32.totalorder %s4442_s14, 0 }
 0x349   : > { %p3327_p10 = scmp.ne.s32.totalorder %s4206_s10, %s3326_s29  ;;  %s3560_s23 = smov [#allocation17]  }
 0x34a   : > { %s3330_s9 = sshll.u32 %s3560_s23, 4  ;;  %s3331_s9 = int_to_ptr.vmem [resolvable:$false] %s3330_s9 }
 0x34b   : > { %p3328_p9 = pnand %p3327_p10, %p4466_p7  ;;  %s3332_s2 = scalar_lea.vmem %s3331_s9, 2048 }
 0x34c   : > { %s2422_s6 = sshll.u32 %s4463_s4, 10  ;;  %p3333_p1 = scmp.lt.s32.totalorder %s4206_s10, %s3331_s9 }
 0x34d   : > { %s4465_s8 = smov %s4464_s20  ;;  %s4203_s1 = scalar_lea.hbm %s4464_s20, %s2422_s6 }
 0x34e   : > { %p3329_p11 = pneg %p3328_p9  ;;  %p3334_p12 = scmp.lt.s32.totalorder %s3332_s2, %s3326_s29 }
 0x350   : > { %p3335_p6 = por %p3334_p12, %p3333_p1 }
 0x352   : > { %p3336_p8 = pnand %p3335_p6, %p3329_p11 }
 0x354   : > { %3339 = shalt.err (!%p3336_p8)
}
 0x355   : > { %s3340_s11 = scalar_lea.hbm %s4203_s1, 1024  ;;  %s3344_s26 = scalar_lea.hbm %s4465_s8, 2048 }
 0x356   : > { %p3341_p4 = scmp.ne.s32.totalorder %s4203_s1, %s3340_s11  ;;  %p3345_p5 = scmp.lt.s32.totalorder %s4203_s1, %s4465_s8 }
 0x357   : > { %p3346_p13 = scmp.lt.s32.totalorder %s3344_s26, %s3340_s11 }
 0x358   : > { %p3342_p0 = pnand %p3341_p4, %p4466_p7 }
 0x359   : > { %p3347_p2 = por %p3346_p13, %p3345_p5 }
 0x35a   : > { %p3343_p3 = pneg %p3342_p0 }
 0x35c   : > { %p3348_p10 = pnand %p3347_p2, %p3343_p3 }
 0x35e   : > { %3351 = shalt.err (!%p3348_p10)
}
 0x35f   : > { %s3561_s6 = smov 64   ;;  %s3562_s30 = smov 4  }
 0x360   : > { %2902 = dma.vmem_to_hbm [thread:$0]  (%p4466_p7), %s4206_s10, 1024, %s4203_s1, %s2023_s15, %s3561_s6, %s3561_s6, %s3562_s30  }
 0x361   : > { %s2421_s13 = sshll.u32 %s4463_s4, 11  ;;  %s2041_s20 = sshll.u32 %s3978_s5, 4  ;;  %s4240_s20 = int_to_ptr.vmem [resolvable:$true] %s2041_s20 }
 0x362   : > { %s4467_s9 = sld [smem:[#allocation51_spill]]  ;;  %s2018_s11 = scalar_lea.sflag [#allocation6], %s3954_s12 }
 0x363   : > { %s3352_s21 = scalar_lea.vmem %s4240_s20, 2048  ;;  %s3563_s1 = smov [#allocation16]  }
 0x364   : > { %p3353_p9 = scmp.ne.s32.totalorder %s4240_s20, %s3352_s21  ;;  %s3356_s10 = sshll.u32 %s3563_s1, 4  ;;  %s3357_s10 = int_to_ptr.vmem [resolvable:$false] %s3356_s10 }
 0x365   : > { %s3358_s5 = scalar_lea.vmem %s3357_s10, 4096  ;;  %p3359_p12 = scmp.lt.s32.totalorder %s4240_s20, %s3357_s10 }
 0x366   : > { %p3354_p11 = pnand %p3353_p9, %p4466_p7  ;;  %p3360_p6 = scmp.lt.s32.totalorder %s3358_s5, %s3352_s21 }
 0x368   : > { %s4238_s2 = scalar_lea.hbm %s4467_s9, %s2421_s13  ;;  %p3355_p1 = pneg %p3354_p11 }
 0x369   : > { %p3361_p8 = por %p3360_p6, %p3359_p12 }
 0x36b   : > { %p3362_p4 = pnand %p3361_p8, %p3355_p1 }
 0x36d   : > { %3365 = shalt.err (!%p3362_p4)
}
 0x36e   : > { %s3366_s22 = scalar_lea.hbm %s4238_s2, 2048  ;;  %s3370_s18 = scalar_lea.hbm %s4467_s9, 4096 }
 0x36f   : > { %p3367_p0 = scmp.ne.s32.totalorder %s4238_s2, %s3366_s22  ;;  %p3371_p13 = scmp.lt.s32.totalorder %s4238_s2, %s4467_s9 }
 0x370   : > { %p3372_p2 = scmp.lt.s32.totalorder %s3370_s18, %s3366_s22 }
 0x371   : > { %p3368_p3 = pnand %p3367_p0, %p4466_p7 }
 0x372   : > { %p3373_p10 = por %p3372_p2, %p3371_p13 }
 0x373   : > { %p3369_p5 = pneg %p3368_p3 }
 0x375   : > { %p3374_p9 = pnand %p3373_p10, %p3369_p5 }
 0x377   : > { %3377 = shalt.err (!%p3374_p9)
}
 0x378   : > { %s3564_s29 = smov 128   ;;  %s3565_s23 = smov 8  }
 0x379   : > { %2901 = dma.vmem_to_hbm [thread:$0]  (%p4466_p7), %s4240_s20, 2048, %s4238_s2, %s2018_s11, %s3564_s29, %s3564_s29, %s3565_s23  }
 0x37a   : > { %s4468_s10 = sld [smem:[#allocation53_spill]]  ;;  %s2073_s22 = sshll.u32 %s3982_s25, 4  ;;  %s2074_s22 = int_to_ptr.vmem [resolvable:$true] %s2073_s22 }
 0x37b   : > { %s3378_s26 = scalar_lea.vmem %s2074_s22, 2048  ;;  %s3566_s28 = smov [#allocation19]  }
 0x37c   : > { %p3379_p11 = scmp.ne.s32.totalorder %s2074_s22, %s3378_s26  ;;  %s3382_s18 = sshll.u32 %s3566_s28, 4  ;;  %s3383_s18 = int_to_ptr.vmem [resolvable:$false] %s3382_s18 }
 0x37d   : > { %s3384_s6 = scalar_lea.vmem %s3383_s18, 4096  ;;  %p3385_p6 = scmp.lt.s32.totalorder %s2074_s22, %s3383_s18 }
 0x37e   : > { %p3380_p1 = pnand %p3379_p11, %p4466_p7  ;;  %p3386_p8 = scmp.lt.s32.totalorder %s3384_s6, %s3378_s26 }
 0x380   : > { %s4273_s5 = scalar_lea.hbm %s4468_s10, %s2421_s13  ;;  %p3381_p12 = pneg %p3380_p1 }
 0x381   : > { %p3387_p4 = por %p3386_p8, %p3385_p6 }
 0x383   : > { %p3388_p0 = pnand %p3387_p4, %p3381_p12 }
 0x385   : > { %3391 = shalt.err (!%p3388_p0)
}
 0x386   : > { %s3392_s12 = scalar_lea.hbm %s4273_s5, 2048  ;;  %s3396_s13 = scalar_lea.hbm %s4468_s10, 4096 }
 0x387   : > { %p3393_p3 = scmp.ne.s32.totalorder %s4273_s5, %s3392_s12  ;;  %p3397_p2 = scmp.lt.s32.totalorder %s4273_s5, %s4468_s10 }
 0x388   : > { %p3398_p10 = scmp.lt.s32.totalorder %s3396_s13, %s3392_s12 }
 0x389   : > { %p3394_p5 = pnand %p3393_p3, %p4466_p7 }
 0x38a   : > { %p3399_p9 = por %p3398_p10, %p3397_p2 }
 0x38b   : > { %p3395_p13 = pneg %p3394_p5 }
 0x38d   : > { %p3400_p11 = pnand %p3399_p9, %p3395_p13 }
 0x38f   : > { %3403 = shalt.err (!%p3400_p11)
}
 0x390   : > { %2903 = dma.vmem_to_hbm [thread:$0]  (%p4466_p7), %s2074_s22, 2048, %s4273_s5, %s2023_s15, %s3564_s29, %s3564_s29, %s3565_s23  }
 0x391 PF: > { %s4469_s11 = sld [smem:[#allocation28_spill]]  ;;  %p2947_p1 = scmp.ge.s32.totalorder %s3546_s27, 2 }
 0x392   : > { %p4470_p12 = scmp.ne.s32.totalorder %s4445_s3, 0 }
 0x394   : > { %p2931_p6 = pnand %p2947_p1, %p4470_p12 }
 0x396   : > { %p2932_p8 = pneg %p2931_p6 }
 0x397   : > { %s2088_s30 = sand.u32 1, %s4469_s11  }
 0x398   : > { %s2089_s21 = scalar_lea.sflag [#allocation6], %s2088_s30 }
 0x399   : > { %3485 = dma.done.wait (%p2932_p8), %s2089_s21, 2048  }
 0x39a   : > { %3487 = vsyncadd (%p2932_p8), %s2089_s21, 4294965248  ;;  %s4471_s14 = sadd.s32 4294967294, %s3546_s27  }
 0x39b   : > { %s2097_s1 = sand.u32 1, %s4471_s14  }
 0x39c   : > { %s2098_s26 = scalar_lea.sflag [#allocation18], %s2097_s1 }
 0x39d   : > { %3489 = dma.done.wait (%p2932_p8), %s2098_s26, 3072  }
 0x39e   : > { %3491 = vsyncadd (%p2932_p8), %s2098_s26, 4294964224  ;;  %s36_s27 = sadd.s32 1, %s3546_s27   ;;  %s4473_s3 = sld [smem:[#allocation41_spill]] }
 0x39f   : > { %p4304_p7 = scmp.ge.s32.totalorder %s36_s27, 6   ;;  %s4474_s20 = sld [smem:[#allocation29_spill]] }
 0x3a0   : > { %s4475_s21 = sld [smem:[#allocation30_spill]]  ;;  %s4481_s15 = smov %s3498_s16 }
 0x3a1   : > { %s4476_s22 = sld [smem:[#allocation40_spill]]  ;;  %s4482_s16 = smov %s3502_s17 }
 0x3a2   : > { %s4477_s23 = sld [smem:[#allocation33_spill]]  ;;  %s4483_s17 = smov %s3865_s24 }
 0x3a3   : > { %s4478_s29 = sld [smem:[#allocation34_spill]]  ;;  %s4484_s18 = smov %s3510_s19 }
 0x3a4   : > { %s4479_s25 = sld [smem:[#allocation36_spill]]  ;;  %s4485_s19 = smov %s3514_s7 }
 0x3a5   : > { %s4480_s26 = sld [smem:[#allocation37_spill]]  ;;  %s4486_s7 = smov %s4473_s3 }
 0x3a6   :  { %35 = sbr.rel (!%p4304_p7) target bundleno = 28 (0x1c), region = 184 }
 0x3a9   : > { %s4487_s24 = smov %s4478_s29 }
 0x3ab   :  { %2112 = vsyncpa [#allocation5], 1 }
 0x3ac   :  { %2114 = vsyncpa [#allocation5 + $0x1], 1 }
 0x3ad   :  { %2115 = vsyncpa [#allocation8], 1 }
 0x3ae   :  { %2117 = vsyncpa [#allocation8 + $0x1], 1 }
 0x3af   :  { %2118 = vsyncpa [#allocation11], 1 }
 0x3b0   :  { %2119 = vsyncpa [#allocation14], 1 }
 0x3b1   :  { %2120 = vsyncpa [#allocation6], 1 }
 0x3b2   :  { %2122 = vsyncpa [#allocation6 + $0x1], 1 }
 0x3b3   :  { %2123 = vsyncpa [#allocation18], 1 }
 0x3b4   :  { %2125 = vsyncpa [#allocation18 + $0x1], 1 }

</bundles_post_ra>
